<compile_context>
chip_gen: v7x
topology: tpu7x:2x2x1
jax: 0.10.0
libtpu: 0.0.40
codegen_flags: <defaults>
</compile_context>

<pallas_src>
import jax
import jax.numpy as jnp
from jax import lax
from jax.experimental import pallas as pl
from jax.experimental.pallas import tpu as pltpu

HIDDEN = 64  # LSTM hidden size (lstm_out_size = 64)


def lstm_mlp_kernel(x_ref, wih_ref, whh_ref, b_ref,
                    w1_ref, b1_ref, w2_ref, b2_ref,
                    w3_ref, b3_ref, wo_ref, bo_ref,
                    out_ref, xp_ref):
    batch = x_ref.shape[0]       # B (sublane padding handled by hardware layout)
    seq_len = x_ref.shape[1]     # T (static)

    # ---- Phase 0: hoisted input projection, off the serial recurrence path.
    # xp[t] = x[:, t, :] @ W_ih^T + (b_ih + b_hh)   written time-major so the
    # recurrence reads xp_ref[t] via a cheap leading-dim index.
    xv = x_ref[...]                              # (B, T, D), single VMEM load
    wih = wih_ref[...]                           # (D, 4H)
    bias = b_ref[...]                            # (1, 4H)
    for t in range(seq_len):                     # static; matmuls pipeline on MXU
        xp_ref[t] = (jnp.dot(xv[:, t, :], wih,
                             preferred_element_type=jnp.float32) + bias)

    # ---- Phase 1: LSTM recurrence, state carried in vregs.
    whh = whh_ref[...]                           # hoisted: loaded once, reused T times
    # Lane mask for the [g|o] half-vreg: lanes 0..63 -> tanh (g), 64..127 -> sigmoid (o).
    lane = lax.broadcasted_iota(jnp.int32, (batch, 2 * HIDDEN), 1)
    g_lane = lane < HIDDEN

    def step(t, carry):
        h, c = carry
        gates = xp_ref[t] + jnp.dot(h, whh, preferred_element_type=jnp.float32)  # (B, 4H)

        # Vreg-aligned, coalesced activations.
        if_act = jax.nn.sigmoid(gates[:, :2 * HIDDEN])        # [sig(i) | sig(f)]  lanes 0..127
        go = gates[:, 2 * HIDDEN:]                             # [g | o]            lanes 0..127
        go_act = jnp.where(g_lane, jnp.tanh(go), jax.nn.sigmoid(go))  # [tanh(g) | sig(o)]

        ig = if_act[:, :HIDDEN] * go_act[:, :HIDDEN]           # i * g   (offset-0 slices)
        f = if_act[:, HIDDEN:]                                 # sig(f)
        o = go_act[:, HIDDEN:]                                 # sig(o)

        c_new = f * c + ig
        h_new = o * jnp.tanh(c_new)
        return h_new, c_new

    h0 = jnp.zeros((batch, HIDDEN), jnp.float32)
    c0 = jnp.zeros((batch, HIDDEN), jnp.float32)
    # Bounded unroll: full unroll at T=8, capped for longer sequences to avoid
    # vreg spills.
    h_last, _ = lax.fori_loop(0, seq_len, step, (h0, c0),
                              unroll=min(seq_len, 8))

    # ---- Phase 2: MLP head on the last hidden state.
    y = jnp.maximum(
        jnp.dot(h_last, w1_ref[...], preferred_element_type=jnp.float32) + b1_ref[...], 0.0)
    y = jnp.maximum(
        jnp.dot(y, w2_ref[...], preferred_element_type=jnp.float32) + b2_ref[...], 0.0)
    y = jnp.maximum(
        jnp.dot(y, w3_ref[...], preferred_element_type=jnp.float32) + b3_ref[...], 0.0)
    # Final 32 -> 1 layer as VPU multiply + lane reduction (no N=1 MXU pass).
    out_ref[...] = jnp.sum(y * wo_ref[...], axis=-1, keepdims=True) + bo_ref[...]


def init_params(key, in_features):
    """Deterministic parameter init (PyTorch-style uniform ranges)."""
    ks = jax.random.split(key, 12)
    u = lambda k, shape, bound: jax.random.uniform(
        k, shape, jnp.float32, minval=-bound, maxval=bound)

    kh = 1.0 / jnp.sqrt(HIDDEN)
    params = {
        "w_ih": u(ks[0], (4 * HIDDEN, in_features), kh),
        "w_hh": u(ks[1], (4 * HIDDEN, HIDDEN), kh),
        "b_ih": u(ks[2], (4 * HIDDEN,), kh),
        "b_hh": u(ks[3], (4 * HIDDEN,), kh),
        "w1": u(ks[4], (128, HIDDEN), 1.0 / jnp.sqrt(HIDDEN)),
        "b1": u(ks[5], (128,), 1.0 / jnp.sqrt(HIDDEN)),
        "w2": u(ks[6], (64, 128), 1.0 / jnp.sqrt(128)),
        "b2": u(ks[7], (64,), 1.0 / jnp.sqrt(128)),
        "w3": u(ks[8], (32, 64), 1.0 / jnp.sqrt(64)),
        "b3": u(ks[9], (32,), 1.0 / jnp.sqrt(64)),
        "wo": u(ks[10], (1, 32), 1.0 / jnp.sqrt(32)),
        "bo": u(ks[11], (1,), 1.0 / jnp.sqrt(32)),
    }
    return params


@jax.jit
def custom_model_forward(x, params):
    # x: (batch, seq, features) float32 — passed to the kernel untouched
    # (no transpose/pad/reshape HBM round trip).
    B, T, D = x.shape

    # Pre-transpose weights so the kernel does row-major x @ W (pure layout,
    # tiny arrays). Gate column order stays i,f,g,o: [i|f] fills the first
    # 128-lane vreg, [g|o] the second — exactly the alignment the kernel wants.
    wih_t = params["w_ih"].T                          # (D, 4H)
    whh_t = params["w_hh"].T                          # (H, 4H)
    b = (params["b_ih"] + params["b_hh"])[None, :]    # (1, 4H)
    w1_t, b1 = params["w1"].T, params["b1"][None, :]  # (64,128), (1,128)
    w2_t, b2 = params["w2"].T, params["b2"][None, :]  # (128,64), (1,64)
    w3_t, b3 = params["w3"].T, params["b3"][None, :]  # (64,32), (1,32)
    wo_row, bo = params["wo"], params["bo"][None, :]  # (1,32), (1,1)

    out = pl.pallas_call(
        lstm_mlp_kernel,
        out_shape=jax.ShapeDtypeStruct((B, 1), jnp.float32),
        # Single invocation (no grid): whole arrays resident in VMEM, no
        # double-buffering.  Time-major projection scratch:
        scratch_shapes=[pltpu.VMEM((T, B, 4 * HIDDEN), jnp.float32)],
    )(x, wih_t, whh_t, b, w1_t, b1, w2_t, b2, w3_t, b3, wo_row, bo)

    # reshape(output.shape[0]) -> (batch,)
    return out[:, 0]


def reference_forward(x, params):
    """Pure-JAX reference matching PyTorch LSTM + MLP semantics."""
    B, T, D = x.shape
    h = jnp.zeros((B, HIDDEN), jnp.float32)
    c = jnp.zeros((B, HIDDEN), jnp.float32)
    for t in range(T):
        gates = (x[:, t, :] @ params["w_ih"].T + params["b_ih"]
                 + h @ params["w_hh"].T + params["b_hh"])
        i = jax.nn.sigmoid(gates[:, :HIDDEN])
        f = jax.nn.sigmoid(gates[:, HIDDEN:2 * HIDDEN])
        g = jnp.tanh(gates[:, 2 * HIDDEN:3 * HIDDEN])
        o = jax.nn.sigmoid(gates[:, 3 * HIDDEN:])
        c = f * c + i * g
        h = o * jnp.tanh(c)
    y = jnp.maximum(h @ params["w1"].T + params["b1"], 0.0)
    y = jnp.maximum(y @ params["w2"].T + params["b2"], 0.0)
    y = jnp.maximum(y @ params["w3"].T + params["b3"], 0.0)
    y = y @ params["wo"].T + params["bo"]
    return y[:, 0]


if __name__ == "__main__":
    B, T, D = 2, 8, 16
    key = jax.random.PRNGKey(0)
    k_x, k_p = jax.random.split(key)
    x = jax.random.normal(k_x, (B, T, D), jnp.float32)
    params = init_params(k_p, D)

    out = custom_model_forward(x, params)
    out = jax.block_until_ready(out)

    ref = reference_forward(x, params)
    assert out.shape == (B,)
    assert jnp.allclose(out, ref, atol=1e-4, rtol=1e-4), (out, ref)

    print("KERNEL_OK")
</pallas_src>

<mosaic_0001>
module attributes {stable_mosaic.version = 11 : i64} {
  func.func @lstm_mlp_kernel(%arg0: memref<2x8x16xf32, #tpu.memory_space<vmem>>, %arg1: memref<16x256xf32, #tpu.memory_space<vmem>>, %arg2: memref<64x256xf32, #tpu.memory_space<vmem>>, %arg3: memref<1x256xf32, #tpu.memory_space<vmem>>, %arg4: memref<64x128xf32, #tpu.memory_space<vmem>>, %arg5: memref<1x128xf32, #tpu.memory_space<vmem>>, %arg6: memref<128x64xf32, #tpu.memory_space<vmem>>, %arg7: memref<1x64xf32, #tpu.memory_space<vmem>>, %arg8: memref<64x32xf32, #tpu.memory_space<vmem>>, %arg9: memref<1x32xf32, #tpu.memory_space<vmem>>, %arg10: memref<1x32xf32, #tpu.memory_space<vmem>>, %arg11: memref<1x1xf32, #tpu.memory_space<vmem>>, %arg12: memref<2x1xf32, #tpu.memory_space<vmem>>, %arg13: memref<8x2x256xf32, #tpu.memory_space<vmem>>) attributes {dimension_semantics = [], scalar_prefetch = 0 : i64, scratch_operands = 1 : i64, tpu.core_type = #tpu.core_type<tc>} {
    %c0 = arith.constant 0 : index
    %c0_0 = arith.constant 0 : index
    %c0_1 = arith.constant 0 : index
    %0 = vector.load %arg0[%c0, %c0_0, %c0_1] : memref<2x8x16xf32, #tpu.memory_space<vmem>>, vector<2x8x16xf32>
    %c0_2 = arith.constant 0 : index
    %c0_3 = arith.constant 0 : index
    %1 = vector.load %arg1[%c0_2, %c0_3] : memref<16x256xf32, #tpu.memory_space<vmem>>, vector<16x256xf32>
    %c0_4 = arith.constant 0 : index
    %c0_5 = arith.constant 0 : index
    %2 = vector.load %arg3[%c0_4, %c0_5] : memref<1x256xf32, #tpu.memory_space<vmem>>, vector<1x256xf32>
    %3 = vector.extract_strided_slice %0 {offsets = [0, 0, 0], sizes = [2, 1, 16], strides = [1, 1, 1]} : vector<2x8x16xf32> to vector<2x1x16xf32>
    %4 = vector.shape_cast %3 : vector<2x1x16xf32> to vector<2x16xf32>
    %cst = arith.constant dense<0.000000e+00> : vector<2x256xf32>
    %5 = tpu.matmul %4, %1, %cst {dimension_numbers = #tpu.dot_dimension_numbers<[1], [0], [0], [1], [0, 0, 1, 1], [], []>} : vector<2x16xf32>, vector<16x256xf32>, vector<2x256xf32> -> vector<2x256xf32>
    %6 = vector.broadcast %2 : vector<1x256xf32> to vector<2x256xf32>
    %7 = arith.addf %5, %6 : vector<2x256xf32>
    %c0_6 = arith.constant 0 : index
    %c0_7 = arith.constant 0 : index
    %c0_8 = arith.constant 0 : index
    %8 = vector.load %arg13[%c0_6, %c0_7, %c0_8] : memref<8x2x256xf32, #tpu.memory_space<vmem>>, vector<1x2x256xf32>
    %9 = vector.shape_cast %8 : vector<1x2x256xf32> to vector<2x256xf32>
    %10 = vector.shape_cast %7 : vector<2x256xf32> to vector<1x2x256xf32>
    tpu.vector_store %arg13[%c0_6, %c0_7, %c0_8], %10 {strides = array<i32>} : memref<8x2x256xf32, #tpu.memory_space<vmem>>, vector<1x2x256xf32>,
    %11 = vector.extract_strided_slice %0 {offsets = [0, 1, 0], sizes = [2, 1, 16], strides = [1, 1, 1]} : vector<2x8x16xf32> to vector<2x1x16xf32>
    %12 = vector.shape_cast %11 : vector<2x1x16xf32> to vector<2x16xf32>
    %cst_9 = arith.constant dense<0.000000e+00> : vector<2x256xf32>
    %13 = tpu.matmul %12, %1, %cst_9 {dimension_numbers = #tpu.dot_dimension_numbers<[1], [0], [0], [1], [0, 0, 1, 1], [], []>} : vector<2x16xf32>, vector<16x256xf32>, vector<2x256xf32> -> vector<2x256xf32>
    %14 = vector.broadcast %2 : vector<1x256xf32> to vector<2x256xf32>
    %15 = arith.addf %13, %14 : vector<2x256xf32>
    %c1 = arith.constant 1 : index
    %c0_10 = arith.constant 0 : index
    %c0_11 = arith.constant 0 : index
    %16 = vector.load %arg13[%c1, %c0_10, %c0_11] : memref<8x2x256xf32, #tpu.memory_space<vmem>>, vector<1x2x256xf32>
    %17 = vector.shape_cast %16 : vector<1x2x256xf32> to vector<2x256xf32>
    %18 = vector.shape_cast %15 : vector<2x256xf32> to vector<1x2x256xf32>
    tpu.vector_store %arg13[%c1, %c0_10, %c0_11], %18 {strides = array<i32>} : memref<8x2x256xf32, #tpu.memory_space<vmem>>, vector<1x2x256xf32>,
    %19 = vector.extract_strided_slice %0 {offsets = [0, 2, 0], sizes = [2, 1, 16], strides = [1, 1, 1]} : vector<2x8x16xf32> to vector<2x1x16xf32>
    %20 = vector.shape_cast %19 : vector<2x1x16xf32> to vector<2x16xf32>
    %cst_12 = arith.constant dense<0.000000e+00> : vector<2x256xf32>
    %21 = tpu.matmul %20, %1, %cst_12 {dimension_numbers = #tpu.dot_dimension_numbers<[1], [0], [0], [1], [0, 0, 1, 1], [], []>} : vector<2x16xf32>, vector<16x256xf32>, vector<2x256xf32> -> vector<2x256xf32>
    %22 = vector.broadcast %2 : vector<1x256xf32> to vector<2x256xf32>
    %23 = arith.addf %21, %22 : vector<2x256xf32>
    %c2 = arith.constant 2 : index
    %c0_13 = arith.constant 0 : index
    %c0_14 = arith.constant 0 : index
    %24 = vector.load %arg13[%c2, %c0_13, %c0_14] : memref<8x2x256xf32, #tpu.memory_space<vmem>>, vector<1x2x256xf32>
    %25 = vector.shape_cast %24 : vector<1x2x256xf32> to vector<2x256xf32>
    %26 = vector.shape_cast %23 : vector<2x256xf32> to vector<1x2x256xf32>
    tpu.vector_store %arg13[%c2, %c0_13, %c0_14], %26 {strides = array<i32>} : memref<8x2x256xf32, #tpu.memory_space<vmem>>, vector<1x2x256xf32>,
    %27 = vector.extract_strided_slice %0 {offsets = [0, 3, 0], sizes = [2, 1, 16], strides = [1, 1, 1]} : vector<2x8x16xf32> to vector<2x1x16xf32>
    %28 = vector.shape_cast %27 : vector<2x1x16xf32> to vector<2x16xf32>
    %cst_15 = arith.constant dense<0.000000e+00> : vector<2x256xf32>
    %29 = tpu.matmul %28, %1, %cst_15 {dimension_numbers = #tpu.dot_dimension_numbers<[1], [0], [0], [1], [0, 0, 1, 1], [], []>} : vector<2x16xf32>, vector<16x256xf32>, vector<2x256xf32> -> vector<2x256xf32>
    %30 = vector.broadcast %2 : vector<1x256xf32> to vector<2x256xf32>
    %31 = arith.addf %29, %30 : vector<2x256xf32>
    %c3 = arith.constant 3 : index
    %c0_16 = arith.constant 0 : index
    %c0_17 = arith.constant 0 : index
    %32 = vector.load %arg13[%c3, %c0_16, %c0_17] : memref<8x2x256xf32, #tpu.memory_space<vmem>>, vector<1x2x256xf32>
    %33 = vector.shape_cast %32 : vector<1x2x256xf32> to vector<2x256xf32>
    %34 = vector.shape_cast %31 : vector<2x256xf32> to vector<1x2x256xf32>
    tpu.vector_store %arg13[%c3, %c0_16, %c0_17], %34 {strides = array<i32>} : memref<8x2x256xf32, #tpu.memory_space<vmem>>, vector<1x2x256xf32>,
    %35 = vector.extract_strided_slice %0 {offsets = [0, 4, 0], sizes = [2, 1, 16], strides = [1, 1, 1]} : vector<2x8x16xf32> to vector<2x1x16xf32>
    %36 = vector.shape_cast %35 : vector<2x1x16xf32> to vector<2x16xf32>
    %cst_18 = arith.constant dense<0.000000e+00> : vector<2x256xf32>
    %37 = tpu.matmul %36, %1, %cst_18 {dimension_numbers = #tpu.dot_dimension_numbers<[1], [0], [0], [1], [0, 0, 1, 1], [], []>} : vector<2x16xf32>, vector<16x256xf32>, vector<2x256xf32> -> vector<2x256xf32>
    %38 = vector.broadcast %2 : vector<1x256xf32> to vector<2x256xf32>
    %39 = arith.addf %37, %38 : vector<2x256xf32>
    %c4 = arith.constant 4 : index
    %c0_19 = arith.constant 0 : index
    %c0_20 = arith.constant 0 : index
    %40 = vector.load %arg13[%c4, %c0_19, %c0_20] : memref<8x2x256xf32, #tpu.memory_space<vmem>>, vector<1x2x256xf32>
    %41 = vector.shape_cast %40 : vector<1x2x256xf32> to vector<2x256xf32>
    %42 = vector.shape_cast %39 : vector<2x256xf32> to vector<1x2x256xf32>
    tpu.vector_store %arg13[%c4, %c0_19, %c0_20], %42 {strides = array<i32>} : memref<8x2x256xf32, #tpu.memory_space<vmem>>, vector<1x2x256xf32>,
    %43 = vector.extract_strided_slice %0 {offsets = [0, 5, 0], sizes = [2, 1, 16], strides = [1, 1, 1]} : vector<2x8x16xf32> to vector<2x1x16xf32>
    %44 = vector.shape_cast %43 : vector<2x1x16xf32> to vector<2x16xf32>
    %cst_21 = arith.constant dense<0.000000e+00> : vector<2x256xf32>
    %45 = tpu.matmul %44, %1, %cst_21 {dimension_numbers = #tpu.dot_dimension_numbers<[1], [0], [0], [1], [0, 0, 1, 1], [], []>} : vector<2x16xf32>, vector<16x256xf32>, vector<2x256xf32> -> vector<2x256xf32>
    %46 = vector.broadcast %2 : vector<1x256xf32> to vector<2x256xf32>
    %47 = arith.addf %45, %46 : vector<2x256xf32>
    %c5 = arith.constant 5 : index
    %c0_22 = arith.constant 0 : index
    %c0_23 = arith.constant 0 : index
    %48 = vector.load %arg13[%c5, %c0_22, %c0_23] : memref<8x2x256xf32, #tpu.memory_space<vmem>>, vector<1x2x256xf32>
    %49 = vector.shape_cast %48 : vector<1x2x256xf32> to vector<2x256xf32>
    %50 = vector.shape_cast %47 : vector<2x256xf32> to vector<1x2x256xf32>
    tpu.vector_store %arg13[%c5, %c0_22, %c0_23], %50 {strides = array<i32>} : memref<8x2x256xf32, #tpu.memory_space<vmem>>, vector<1x2x256xf32>,
    %51 = vector.extract_strided_slice %0 {offsets = [0, 6, 0], sizes = [2, 1, 16], strides = [1, 1, 1]} : vector<2x8x16xf32> to vector<2x1x16xf32>
    %52 = vector.shape_cast %51 : vector<2x1x16xf32> to vector<2x16xf32>
    %cst_24 = arith.constant dense<0.000000e+00> : vector<2x256xf32>
    %53 = tpu.matmul %52, %1, %cst_24 {dimension_numbers = #tpu.dot_dimension_numbers<[1], [0], [0], [1], [0, 0, 1, 1], [], []>} : vector<2x16xf32>, vector<16x256xf32>, vector<2x256xf32> -> vector<2x256xf32>
    %54 = vector.broadcast %2 : vector<1x256xf32> to vector<2x256xf32>
    %55 = arith.addf %53, %54 : vector<2x256xf32>
    %c6 = arith.constant 6 : index
    %c0_25 = arith.constant 0 : index
    %c0_26 = arith.constant 0 : index
    %56 = vector.load %arg13[%c6, %c0_25, %c0_26] : memref<8x2x256xf32, #tpu.memory_space<vmem>>, vector<1x2x256xf32>
    %57 = vector.shape_cast %56 : vector<1x2x256xf32> to vector<2x256xf32>
    %58 = vector.shape_cast %55 : vector<2x256xf32> to vector<1x2x256xf32>
    tpu.vector_store %arg13[%c6, %c0_25, %c0_26], %58 {strides = array<i32>} : memref<8x2x256xf32, #tpu.memory_space<vmem>>, vector<1x2x256xf32>,
    %59 = vector.extract_strided_slice %0 {offsets = [0, 7, 0], sizes = [2, 1, 16], strides = [1, 1, 1]} : vector<2x8x16xf32> to vector<2x1x16xf32>
    %60 = vector.shape_cast %59 : vector<2x1x16xf32> to vector<2x16xf32>
    %cst_27 = arith.constant dense<0.000000e+00> : vector<2x256xf32>
    %61 = tpu.matmul %60, %1, %cst_27 {dimension_numbers = #tpu.dot_dimension_numbers<[1], [0], [0], [1], [0, 0, 1, 1], [], []>} : vector<2x16xf32>, vector<16x256xf32>, vector<2x256xf32> -> vector<2x256xf32>
    %62 = vector.broadcast %2 : vector<1x256xf32> to vector<2x256xf32>
    %63 = arith.addf %61, %62 : vector<2x256xf32>
    %c7 = arith.constant 7 : index
    %c0_28 = arith.constant 0 : index
    %c0_29 = arith.constant 0 : index
    %64 = vector.load %arg13[%c7, %c0_28, %c0_29] : memref<8x2x256xf32, #tpu.memory_space<vmem>>, vector<1x2x256xf32>
    %65 = vector.shape_cast %64 : vector<1x2x256xf32> to vector<2x256xf32>
    %66 = vector.shape_cast %63 : vector<2x256xf32> to vector<1x2x256xf32>
    tpu.vector_store %arg13[%c7, %c0_28, %c0_29], %66 {strides = array<i32>} : memref<8x2x256xf32, #tpu.memory_space<vmem>>, vector<1x2x256xf32>,
    %c0_30 = arith.constant 0 : index
    %c0_31 = arith.constant 0 : index
    %67 = vector.load %arg2[%c0_30, %c0_31] : memref<64x256xf32, #tpu.memory_space<vmem>>, vector<64x256xf32>
    %68 = tpu.iota {dimensions = array<i32: 1>} : vector<2x128xi32>
    %c64_i32 = arith.constant 64 : i32
    %69 = vector.broadcast %c64_i32 : i32 to vector<2x128xi32>
    %70 = arith.cmpi slt, %68, %69 : vector<2x128xi32>
    %cst_32 = arith.constant 0.000000e+00 : f32
    %71 = vector.broadcast %cst_32 : f32 to vector<2x64xf32>
    %cst_33 = arith.constant 0.000000e+00 : f32
    %72 = vector.broadcast %cst_33 : f32 to vector<2x64xf32>
    %c0_i32 = arith.constant 0 : i32
    %73 = arith.index_cast %c0_i32 : i32 to index
    %c0_34 = arith.constant 0 : index
    %c0_35 = arith.constant 0 : index
    %74 = vector.load %arg13[%73, %c0_34, %c0_35] : memref<8x2x256xf32, #tpu.memory_space<vmem>>, vector<1x2x256xf32>
    %75 = vector.shape_cast %74 : vector<1x2x256xf32> to vector<2x256xf32>
    %cst_36 = arith.constant dense<0.000000e+00> : vector<2x256xf32>
    %76 = tpu.matmul %71, %67, %cst_36 {dimension_numbers = #tpu.dot_dimension_numbers<[1], [0], [0], [1], [0, 0, 1, 1], [], []>} : vector<2x64xf32>, vector<64x256xf32>, vector<2x256xf32> -> vector<2x256xf32>
    %77 = arith.addf %75, %76 : vector<2x256xf32>
    %78 = vector.extract_strided_slice %77 {offsets = [0, 0], sizes = [2, 128], strides = [1, 1]} : vector<2x256xf32> to vector<2x128xf32>
    %79 = arith.negf %78 : vector<2x128xf32>
    %80 = math.exp %79 : vector<2x128xf32>
    %cst_37 = arith.constant 1.000000e+00 : f32
    %81 = vector.broadcast %cst_37 : f32 to vector<2x128xf32>
    %82 = arith.addf %81, %80 : vector<2x128xf32>
    %83 = arith.divf %81, %82 : vector<2x128xf32>
    %84 = vector.extract_strided_slice %77 {offsets = [0, 128], sizes = [2, 128], strides = [1, 1]} : vector<2x256xf32> to vector<2x128xf32>
    %85 = math.tanh %84 : vector<2x128xf32>
    %86 = arith.negf %84 : vector<2x128xf32>
    %87 = math.exp %86 : vector<2x128xf32>
    %cst_38 = arith.constant 1.000000e+00 : f32
    %88 = vector.broadcast %cst_38 : f32 to vector<2x128xf32>
    %89 = arith.addf %88, %87 : vector<2x128xf32>
    %90 = arith.divf %88, %89 : vector<2x128xf32>
    %91 = arith.select %70, %85, %90 : vector<2x128xi1>, vector<2x128xf32>
    %92 = vector.extract_strided_slice %83 {offsets = [0, 0], sizes = [2, 64], strides = [1, 1]} : vector<2x128xf32> to vector<2x64xf32>
    %93 = vector.extract_strided_slice %91 {offsets = [0, 0], sizes = [2, 64], strides = [1, 1]} : vector<2x128xf32> to vector<2x64xf32>
    %94 = arith.mulf %92, %93 : vector<2x64xf32>
    %95 = vector.extract_strided_slice %83 {offsets = [0, 64], sizes = [2, 64], strides = [1, 1]} : vector<2x128xf32> to vector<2x64xf32>
    %96 = vector.extract_strided_slice %91 {offsets = [0, 64], sizes = [2, 64], strides = [1, 1]} : vector<2x128xf32> to vector<2x64xf32>
    %97 = arith.mulf %95, %72 : vector<2x64xf32>
    %98 = arith.addf %97, %94 : vector<2x64xf32>
    %99 = math.tanh %98 : vector<2x64xf32>
    %100 = arith.mulf %96, %99 : vector<2x64xf32>
    %c1_i32 = arith.constant 1 : i32
    %101 = arith.index_cast %c1_i32 : i32 to index
    %c0_39 = arith.constant 0 : index
    %c0_40 = arith.constant 0 : index
    %102 = vector.load %arg13[%101, %c0_39, %c0_40] : memref<8x2x256xf32, #tpu.memory_space<vmem>>, vector<1x2x256xf32>
    %103 = vector.shape_cast %102 : vector<1x2x256xf32> to vector<2x256xf32>
    %cst_41 = arith.constant dense<0.000000e+00> : vector<2x256xf32>
    %104 = tpu.matmul %100, %67, %cst_41 {dimension_numbers = #tpu.dot_dimension_numbers<[1], [0], [0], [1], [0, 0, 1, 1], [], []>} : vector<2x64xf32>, vector<64x256xf32>, vector<2x256xf32> -> vector<2x256xf32>
    %105 = arith.addf %103, %104 : vector<2x256xf32>
    %106 = vector.extract_strided_slice %105 {offsets = [0, 0], sizes = [2, 128], strides = [1, 1]} : vector<2x256xf32> to vector<2x128xf32>
    %107 = arith.negf %106 : vector<2x128xf32>
    %108 = math.exp %107 : vector<2x128xf32>
    %cst_42 = arith.constant 1.000000e+00 : f32
    %109 = vector.broadcast %cst_42 : f32 to vector<2x128xf32>
    %110 = arith.addf %109, %108 : vector<2x128xf32>
    %111 = arith.divf %109, %110 : vector<2x128xf32>
    %112 = vector.extract_strided_slice %105 {offsets = [0, 128], sizes = [2, 128], strides = [1, 1]} : vector<2x256xf32> to vector<2x128xf32>
    %113 = math.tanh %112 : vector<2x128xf32>
    %114 = arith.negf %112 : vector<2x128xf32>
    %115 = math.exp %114 : vector<2x128xf32>
    %cst_43 = arith.constant 1.000000e+00 : f32
    %116 = vector.broadcast %cst_43 : f32 to vector<2x128xf32>
    %117 = arith.addf %116, %115 : vector<2x128xf32>
    %118 = arith.divf %116, %117 : vector<2x128xf32>
    %119 = arith.select %70, %113, %118 : vector<2x128xi1>, vector<2x128xf32>
    %120 = vector.extract_strided_slice %111 {offsets = [0, 0], sizes = [2, 64], strides = [1, 1]} : vector<2x128xf32> to vector<2x64xf32>
    %121 = vector.extract_strided_slice %119 {offsets = [0, 0], sizes = [2, 64], strides = [1, 1]} : vector<2x128xf32> to vector<2x64xf32>
    %122 = arith.mulf %120, %121 : vector<2x64xf32>
    %123 = vector.extract_strided_slice %111 {offsets = [0, 64], sizes = [2, 64], strides = [1, 1]} : vector<2x128xf32> to vector<2x64xf32>
    %124 = vector.extract_strided_slice %119 {offsets = [0, 64], sizes = [2, 64], strides = [1, 1]} : vector<2x128xf32> to vector<2x64xf32>
    %125 = arith.mulf %123, %98 : vector<2x64xf32>
    %126 = arith.addf %125, %122 : vector<2x64xf32>
    %127 = math.tanh %126 : vector<2x64xf32>
    %128 = arith.mulf %124, %127 : vector<2x64xf32>
    %c2_i32 = arith.constant 2 : i32
    %129 = arith.index_cast %c2_i32 : i32 to index
    %c0_44 = arith.constant 0 : index
    %c0_45 = arith.constant 0 : index
    %130 = vector.load %arg13[%129, %c0_44, %c0_45] : memref<8x2x256xf32, #tpu.memory_space<vmem>>, vector<1x2x256xf32>
    %131 = vector.shape_cast %130 : vector<1x2x256xf32> to vector<2x256xf32>
    %cst_46 = arith.constant dense<0.000000e+00> : vector<2x256xf32>
    %132 = tpu.matmul %128, %67, %cst_46 {dimension_numbers = #tpu.dot_dimension_numbers<[1], [0], [0], [1], [0, 0, 1, 1], [], []>} : vector<2x64xf32>, vector<64x256xf32>, vector<2x256xf32> -> vector<2x256xf32>
    %133 = arith.addf %131, %132 : vector<2x256xf32>
    %134 = vector.extract_strided_slice %133 {offsets = [0, 0], sizes = [2, 128], strides = [1, 1]} : vector<2x256xf32> to vector<2x128xf32>
    %135 = arith.negf %134 : vector<2x128xf32>
    %136 = math.exp %135 : vector<2x128xf32>
    %cst_47 = arith.constant 1.000000e+00 : f32
    %137 = vector.broadcast %cst_47 : f32 to vector<2x128xf32>
    %138 = arith.addf %137, %136 : vector<2x128xf32>
    %139 = arith.divf %137, %138 : vector<2x128xf32>
    %140 = vector.extract_strided_slice %133 {offsets = [0, 128], sizes = [2, 128], strides = [1, 1]} : vector<2x256xf32> to vector<2x128xf32>
    %141 = math.tanh %140 : vector<2x128xf32>
    %142 = arith.negf %140 : vector<2x128xf32>
    %143 = math.exp %142 : vector<2x128xf32>
    %cst_48 = arith.constant 1.000000e+00 : f32
    %144 = vector.broadcast %cst_48 : f32 to vector<2x128xf32>
    %145 = arith.addf %144, %143 : vector<2x128xf32>
    %146 = arith.divf %144, %145 : vector<2x128xf32>
    %147 = arith.select %70, %141, %146 : vector<2x128xi1>, vector<2x128xf32>
    %148 = vector.extract_strided_slice %139 {offsets = [0, 0], sizes = [2, 64], strides = [1, 1]} : vector<2x128xf32> to vector<2x64xf32>
    %149 = vector.extract_strided_slice %147 {offsets = [0, 0], sizes = [2, 64], strides = [1, 1]} : vector<2x128xf32> to vector<2x64xf32>
    %150 = arith.mulf %148, %149 : vector<2x64xf32>
    %151 = vector.extract_strided_slice %139 {offsets = [0, 64], sizes = [2, 64], strides = [1, 1]} : vector<2x128xf32> to vector<2x64xf32>
    %152 = vector.extract_strided_slice %147 {offsets = [0, 64], sizes = [2, 64], strides = [1, 1]} : vector<2x128xf32> to vector<2x64xf32>
    %153 = arith.mulf %151, %126 : vector<2x64xf32>
    %154 = arith.addf %153, %150 : vector<2x64xf32>
    %155 = math.tanh %154 : vector<2x64xf32>
    %156 = arith.mulf %152, %155 : vector<2x64xf32>
    %c3_i32 = arith.constant 3 : i32
    %157 = arith.index_cast %c3_i32 : i32 to index
    %c0_49 = arith.constant 0 : index
    %c0_50 = arith.constant 0 : index
    %158 = vector.load %arg13[%157, %c0_49, %c0_50] : memref<8x2x256xf32, #tpu.memory_space<vmem>>, vector<1x2x256xf32>
    %159 = vector.shape_cast %158 : vector<1x2x256xf32> to vector<2x256xf32>
    %cst_51 = arith.constant dense<0.000000e+00> : vector<2x256xf32>
    %160 = tpu.matmul %156, %67, %cst_51 {dimension_numbers = #tpu.dot_dimension_numbers<[1], [0], [0], [1], [0, 0, 1, 1], [], []>} : vector<2x64xf32>, vector<64x256xf32>, vector<2x256xf32> -> vector<2x256xf32>
    %161 = arith.addf %159, %160 : vector<2x256xf32>
    %162 = vector.extract_strided_slice %161 {offsets = [0, 0], sizes = [2, 128], strides = [1, 1]} : vector<2x256xf32> to vector<2x128xf32>
    %163 = arith.negf %162 : vector<2x128xf32>
    %164 = math.exp %163 : vector<2x128xf32>
    %cst_52 = arith.constant 1.000000e+00 : f32
    %165 = vector.broadcast %cst_52 : f32 to vector<2x128xf32>
    %166 = arith.addf %165, %164 : vector<2x128xf32>
    %167 = arith.divf %165, %166 : vector<2x128xf32>
    %168 = vector.extract_strided_slice %161 {offsets = [0, 128], sizes = [2, 128], strides = [1, 1]} : vector<2x256xf32> to vector<2x128xf32>
    %169 = math.tanh %168 : vector<2x128xf32>
    %170 = arith.negf %168 : vector<2x128xf32>
    %171 = math.exp %170 : vector<2x128xf32>
    %cst_53 = arith.constant 1.000000e+00 : f32
    %172 = vector.broadcast %cst_53 : f32 to vector<2x128xf32>
    %173 = arith.addf %172, %171 : vector<2x128xf32>
    %174 = arith.divf %172, %173 : vector<2x128xf32>
    %175 = arith.select %70, %169, %174 : vector<2x128xi1>, vector<2x128xf32>
    %176 = vector.extract_strided_slice %167 {offsets = [0, 0], sizes = [2, 64], strides = [1, 1]} : vector<2x128xf32> to vector<2x64xf32>
    %177 = vector.extract_strided_slice %175 {offsets = [0, 0], sizes = [2, 64], strides = [1, 1]} : vector<2x128xf32> to vector<2x64xf32>
    %178 = arith.mulf %176, %177 : vector<2x64xf32>
    %179 = vector.extract_strided_slice %167 {offsets = [0, 64], sizes = [2, 64], strides = [1, 1]} : vector<2x128xf32> to vector<2x64xf32>
    %180 = vector.extract_strided_slice %175 {offsets = [0, 64], sizes = [2, 64], strides = [1, 1]} : vector<2x128xf32> to vector<2x64xf32>
    %181 = arith.mulf %179, %154 : vector<2x64xf32>
    %182 = arith.addf %181, %178 : vector<2x64xf32>
    %183 = math.tanh %182 : vector<2x64xf32>
    %184 = arith.mulf %180, %183 : vector<2x64xf32>
    %c4_i32 = arith.constant 4 : i32
    %185 = arith.index_cast %c4_i32 : i32 to index
    %c0_54 = arith.constant 0 : index
    %c0_55 = arith.constant 0 : index
    %186 = vector.load %arg13[%185, %c0_54, %c0_55] : memref<8x2x256xf32, #tpu.memory_space<vmem>>, vector<1x2x256xf32>
    %187 = vector.shape_cast %186 : vector<1x2x256xf32> to vector<2x256xf32>
    %cst_56 = arith.constant dense<0.000000e+00> : vector<2x256xf32>
    %188 = tpu.matmul %184, %67, %cst_56 {dimension_numbers = #tpu.dot_dimension_numbers<[1], [0], [0], [1], [0, 0, 1, 1], [], []>} : vector<2x64xf32>, vector<64x256xf32>, vector<2x256xf32> -> vector<2x256xf32>
    %189 = arith.addf %187, %188 : vector<2x256xf32>
    %190 = vector.extract_strided_slice %189 {offsets = [0, 0], sizes = [2, 128], strides = [1, 1]} : vector<2x256xf32> to vector<2x128xf32>
    %191 = arith.negf %190 : vector<2x128xf32>
    %192 = math.exp %191 : vector<2x128xf32>
    %cst_57 = arith.constant 1.000000e+00 : f32
    %193 = vector.broadcast %cst_57 : f32 to vector<2x128xf32>
    %194 = arith.addf %193, %192 : vector<2x128xf32>
    %195 = arith.divf %193, %194 : vector<2x128xf32>
    %196 = vector.extract_strided_slice %189 {offsets = [0, 128], sizes = [2, 128], strides = [1, 1]} : vector<2x256xf32> to vector<2x128xf32>
    %197 = math.tanh %196 : vector<2x128xf32>
    %198 = arith.negf %196 : vector<2x128xf32>
    %199 = math.exp %198 : vector<2x128xf32>
    %cst_58 = arith.constant 1.000000e+00 : f32
    %200 = vector.broadcast %cst_58 : f32 to vector<2x128xf32>
    %201 = arith.addf %200, %199 : vector<2x128xf32>
    %202 = arith.divf %200, %201 : vector<2x128xf32>
    %203 = arith.select %70, %197, %202 : vector<2x128xi1>, vector<2x128xf32>
    %204 = vector.extract_strided_slice %195 {offsets = [0, 0], sizes = [2, 64], strides = [1, 1]} : vector<2x128xf32> to vector<2x64xf32>
    %205 = vector.extract_strided_slice %203 {offsets = [0, 0], sizes = [2, 64], strides = [1, 1]} : vector<2x128xf32> to vector<2x64xf32>
    %206 = arith.mulf %204, %205 : vector<2x64xf32>
    %207 = vector.extract_strided_slice %195 {offsets = [0, 64], sizes = [2, 64], strides = [1, 1]} : vector<2x128xf32> to vector<2x64xf32>
    %208 = vector.extract_strided_slice %203 {offsets = [0, 64], sizes = [2, 64], strides = [1, 1]} : vector<2x128xf32> to vector<2x64xf32>
    %209 = arith.mulf %207, %182 : vector<2x64xf32>
    %210 = arith.addf %209, %206 : vector<2x64xf32>
    %211 = math.tanh %210 : vector<2x64xf32>
    %212 = arith.mulf %208, %211 : vector<2x64xf32>
    %c5_i32 = arith.constant 5 : i32
    %213 = arith.index_cast %c5_i32 : i32 to index
    %c0_59 = arith.constant 0 : index
    %c0_60 = arith.constant 0 : index
    %214 = vector.load %arg13[%213, %c0_59, %c0_60] : memref<8x2x256xf32, #tpu.memory_space<vmem>>, vector<1x2x256xf32>
    %215 = vector.shape_cast %214 : vector<1x2x256xf32> to vector<2x256xf32>
    %cst_61 = arith.constant dense<0.000000e+00> : vector<2x256xf32>
    %216 = tpu.matmul %212, %67, %cst_61 {dimension_numbers = #tpu.dot_dimension_numbers<[1], [0], [0], [1], [0, 0, 1, 1], [], []>} : vector<2x64xf32>, vector<64x256xf32>, vector<2x256xf32> -> vector<2x256xf32>
    %217 = arith.addf %215, %216 : vector<2x256xf32>
    %218 = vector.extract_strided_slice %217 {offsets = [0, 0], sizes = [2, 128], strides = [1, 1]} : vector<2x256xf32> to vector<2x128xf32>
    %219 = arith.negf %218 : vector<2x128xf32>
    %220 = math.exp %219 : vector<2x128xf32>
    %cst_62 = arith.constant 1.000000e+00 : f32
    %221 = vector.broadcast %cst_62 : f32 to vector<2x128xf32>
    %222 = arith.addf %221, %220 : vector<2x128xf32>
    %223 = arith.divf %221, %222 : vector<2x128xf32>
    %224 = vector.extract_strided_slice %217 {offsets = [0, 128], sizes = [2, 128], strides = [1, 1]} : vector<2x256xf32> to vector<2x128xf32>
    %225 = math.tanh %224 : vector<2x128xf32>
    %226 = arith.negf %224 : vector<2x128xf32>
    %227 = math.exp %226 : vector<2x128xf32>
    %cst_63 = arith.constant 1.000000e+00 : f32
    %228 = vector.broadcast %cst_63 : f32 to vector<2x128xf32>
    %229 = arith.addf %228, %227 : vector<2x128xf32>
    %230 = arith.divf %228, %229 : vector<2x128xf32>
    %231 = arith.select %70, %225, %230 : vector<2x128xi1>, vector<2x128xf32>
    %232 = vector.extract_strided_slice %223 {offsets = [0, 0], sizes = [2, 64], strides = [1, 1]} : vector<2x128xf32> to vector<2x64xf32>
    %233 = vector.extract_strided_slice %231 {offsets = [0, 0], sizes = [2, 64], strides = [1, 1]} : vector<2x128xf32> to vector<2x64xf32>
    %234 = arith.mulf %232, %233 : vector<2x64xf32>
    %235 = vector.extract_strided_slice %223 {offsets = [0, 64], sizes = [2, 64], strides = [1, 1]} : vector<2x128xf32> to vector<2x64xf32>
    %236 = vector.extract_strided_slice %231 {offsets = [0, 64], sizes = [2, 64], strides = [1, 1]} : vector<2x128xf32> to vector<2x64xf32>
    %237 = arith.mulf %235, %210 : vector<2x64xf32>
    %238 = arith.addf %237, %234 : vector<2x64xf32>
    %239 = math.tanh %238 : vector<2x64xf32>
    %240 = arith.mulf %236, %239 : vector<2x64xf32>
    %c6_i32 = arith.constant 6 : i32
    %241 = arith.index_cast %c6_i32 : i32 to index
    %c0_64 = arith.constant 0 : index
    %c0_65 = arith.constant 0 : index
    %242 = vector.load %arg13[%241, %c0_64, %c0_65] : memref<8x2x256xf32, #tpu.memory_space<vmem>>, vector<1x2x256xf32>
    %243 = vector.shape_cast %242 : vector<1x2x256xf32> to vector<2x256xf32>
    %cst_66 = arith.constant dense<0.000000e+00> : vector<2x256xf32>
    %244 = tpu.matmul %240, %67, %cst_66 {dimension_numbers = #tpu.dot_dimension_numbers<[1], [0], [0], [1], [0, 0, 1, 1], [], []>} : vector<2x64xf32>, vector<64x256xf32>, vector<2x256xf32> -> vector<2x256xf32>
    %245 = arith.addf %243, %244 : vector<2x256xf32>
    %246 = vector.extract_strided_slice %245 {offsets = [0, 0], sizes = [2, 128], strides = [1, 1]} : vector<2x256xf32> to vector<2x128xf32>
    %247 = arith.negf %246 : vector<2x128xf32>
    %248 = math.exp %247 : vector<2x128xf32>
    %cst_67 = arith.constant 1.000000e+00 : f32
    %249 = vector.broadcast %cst_67 : f32 to vector<2x128xf32>
    %250 = arith.addf %249, %248 : vector<2x128xf32>
    %251 = arith.divf %249, %250 : vector<2x128xf32>
    %252 = vector.extract_strided_slice %245 {offsets = [0, 128], sizes = [2, 128], strides = [1, 1]} : vector<2x256xf32> to vector<2x128xf32>
    %253 = math.tanh %252 : vector<2x128xf32>
    %254 = arith.negf %252 : vector<2x128xf32>
    %255 = math.exp %254 : vector<2x128xf32>
    %cst_68 = arith.constant 1.000000e+00 : f32
    %256 = vector.broadcast %cst_68 : f32 to vector<2x128xf32>
    %257 = arith.addf %256, %255 : vector<2x128xf32>
    %258 = arith.divf %256, %257 : vector<2x128xf32>
    %259 = arith.select %70, %253, %258 : vector<2x128xi1>, vector<2x128xf32>
    %260 = vector.extract_strided_slice %251 {offsets = [0, 0], sizes = [2, 64], strides = [1, 1]} : vector<2x128xf32> to vector<2x64xf32>
    %261 = vector.extract_strided_slice %259 {offsets = [0, 0], sizes = [2, 64], strides = [1, 1]} : vector<2x128xf32> to vector<2x64xf32>
    %262 = arith.mulf %260, %261 : vector<2x64xf32>
    %263 = vector.extract_strided_slice %251 {offsets = [0, 64], sizes = [2, 64], strides = [1, 1]} : vector<2x128xf32> to vector<2x64xf32>
    %264 = vector.extract_strided_slice %259 {offsets = [0, 64], sizes = [2, 64], strides = [1, 1]} : vector<2x128xf32> to vector<2x64xf32>
    %265 = arith.mulf %263, %238 : vector<2x64xf32>
    %266 = arith.addf %265, %262 : vector<2x64xf32>
    %267 = math.tanh %266 : vector<2x64xf32>
    %268 = arith.mulf %264, %267 : vector<2x64xf32>
    %c7_i32 = arith.constant 7 : i32
    %269 = arith.index_cast %c7_i32 : i32 to index
    %c0_69 = arith.constant 0 : index
    %c0_70 = arith.constant 0 : index
    %270 = vector.load %arg13[%269, %c0_69, %c0_70] : memref<8x2x256xf32, #tpu.memory_space<vmem>>, vector<1x2x256xf32>
    %271 = vector.shape_cast %270 : vector<1x2x256xf32> to vector<2x256xf32>
    %cst_71 = arith.constant dense<0.000000e+00> : vector<2x256xf32>
    %272 = tpu.matmul %268, %67, %cst_71 {dimension_numbers = #tpu.dot_dimension_numbers<[1], [0], [0], [1], [0, 0, 1, 1], [], []>} : vector<2x64xf32>, vector<64x256xf32>, vector<2x256xf32> -> vector<2x256xf32>
    %273 = arith.addf %271, %272 : vector<2x256xf32>
    %274 = vector.extract_strided_slice %273 {offsets = [0, 0], sizes = [2, 128], strides = [1, 1]} : vector<2x256xf32> to vector<2x128xf32>
    %275 = arith.negf %274 : vector<2x128xf32>
    %276 = math.exp %275 : vector<2x128xf32>
    %cst_72 = arith.constant 1.000000e+00 : f32
    %277 = vector.broadcast %cst_72 : f32 to vector<2x128xf32>
    %278 = arith.addf %277, %276 : vector<2x128xf32>
    %279 = arith.divf %277, %278 : vector<2x128xf32>
    %280 = vector.extract_strided_slice %273 {offsets = [0, 128], sizes = [2, 128], strides = [1, 1]} : vector<2x256xf32> to vector<2x128xf32>
    %281 = math.tanh %280 : vector<2x128xf32>
    %282 = arith.negf %280 : vector<2x128xf32>
    %283 = math.exp %282 : vector<2x128xf32>
    %cst_73 = arith.constant 1.000000e+00 : f32
    %284 = vector.broadcast %cst_73 : f32 to vector<2x128xf32>
    %285 = arith.addf %284, %283 : vector<2x128xf32>
    %286 = arith.divf %284, %285 : vector<2x128xf32>
    %287 = arith.select %70, %281, %286 : vector<2x128xi1>, vector<2x128xf32>
    %288 = vector.extract_strided_slice %279 {offsets = [0, 0], sizes = [2, 64], strides = [1, 1]} : vector<2x128xf32> to vector<2x64xf32>
    %289 = vector.extract_strided_slice %287 {offsets = [0, 0], sizes = [2, 64], strides = [1, 1]} : vector<2x128xf32> to vector<2x64xf32>
    %290 = arith.mulf %288, %289 : vector<2x64xf32>
    %291 = vector.extract_strided_slice %279 {offsets = [0, 64], sizes = [2, 64], strides = [1, 1]} : vector<2x128xf32> to vector<2x64xf32>
    %292 = vector.extract_strided_slice %287 {offsets = [0, 64], sizes = [2, 64], strides = [1, 1]} : vector<2x128xf32> to vector<2x64xf32>
    %293 = arith.mulf %291, %266 : vector<2x64xf32>
    %294 = arith.addf %293, %290 : vector<2x64xf32>
    %295 = math.tanh %294 : vector<2x64xf32>
    %296 = arith.mulf %292, %295 : vector<2x64xf32>
    %c8_i32 = arith.constant 8 : i32
    %c0_74 = arith.constant 0 : index
    %c0_75 = arith.constant 0 : index
    %297 = vector.load %arg4[%c0_74, %c0_75] : memref<64x128xf32, #tpu.memory_space<vmem>>, vector<64x128xf32>
    %cst_76 = arith.constant dense<0.000000e+00> : vector<2x128xf32>
    %298 = tpu.matmul %296, %297, %cst_76 {dimension_numbers = #tpu.dot_dimension_numbers<[1], [0], [0], [1], [0, 0, 1, 1], [], []>} : vector<2x64xf32>, vector<64x128xf32>, vector<2x128xf32> -> vector<2x128xf32>
    %c0_77 = arith.constant 0 : index
    %c0_78 = arith.constant 0 : index
    %299 = vector.load %arg5[%c0_77, %c0_78] : memref<1x128xf32, #tpu.memory_space<vmem>>, vector<1x128xf32>
    %300 = vector.broadcast %299 : vector<1x128xf32> to vector<2x128xf32>
    %301 = arith.addf %298, %300 : vector<2x128xf32>
    %cst_79 = arith.constant 0.000000e+00 : f32
    %302 = vector.broadcast %cst_79 : f32 to vector<2x128xf32>
    %303 = arith.maximumf %301, %302 : vector<2x128xf32>
    %c0_80 = arith.constant 0 : index
    %c0_81 = arith.constant 0 : index
    %304 = vector.load %arg6[%c0_80, %c0_81] : memref<128x64xf32, #tpu.memory_space<vmem>>, vector<128x64xf32>
    %cst_82 = arith.constant dense<0.000000e+00> : vector<2x64xf32>
    %305 = tpu.matmul %303, %304, %cst_82 {dimension_numbers = #tpu.dot_dimension_numbers<[1], [0], [0], [1], [0, 0, 1, 1], [], []>} : vector<2x128xf32>, vector<128x64xf32>, vector<2x64xf32> -> vector<2x64xf32>
    %c0_83 = arith.constant 0 : index
    %c0_84 = arith.constant 0 : index
    %306 = vector.load %arg7[%c0_83, %c0_84] : memref<1x64xf32, #tpu.memory_space<vmem>>, vector<1x64xf32>
    %307 = vector.broadcast %306 : vector<1x64xf32> to vector<2x64xf32>
    %308 = arith.addf %305, %307 : vector<2x64xf32>
    %cst_85 = arith.constant 0.000000e+00 : f32
    %309 = vector.broadcast %cst_85 : f32 to vector<2x64xf32>
    %310 = arith.maximumf %308, %309 : vector<2x64xf32>
    %c0_86 = arith.constant 0 : index
    %c0_87 = arith.constant 0 : index
    %311 = vector.load %arg8[%c0_86, %c0_87] : memref<64x32xf32, #tpu.memory_space<vmem>>, vector<64x32xf32>
    %cst_88 = arith.constant dense<0.000000e+00> : vector<2x32xf32>
    %312 = tpu.matmul %310, %311, %cst_88 {dimension_numbers = #tpu.dot_dimension_numbers<[1], [0], [0], [1], [0, 0, 1, 1], [], []>} : vector<2x64xf32>, vector<64x32xf32>, vector<2x32xf32> -> vector<2x32xf32>
    %c0_89 = arith.constant 0 : index
    %c0_90 = arith.constant 0 : index
    %313 = vector.load %arg9[%c0_89, %c0_90] : memref<1x32xf32, #tpu.memory_space<vmem>>, vector<1x32xf32>
    %314 = vector.broadcast %313 : vector<1x32xf32> to vector<2x32xf32>
    %315 = arith.addf %312, %314 : vector<2x32xf32>
    %cst_91 = arith.constant 0.000000e+00 : f32
    %316 = vector.broadcast %cst_91 : f32 to vector<2x32xf32>
    %317 = arith.maximumf %315, %316 : vector<2x32xf32>
    %c0_92 = arith.constant 0 : index
    %c0_93 = arith.constant 0 : index
    %318 = vector.load %arg10[%c0_92, %c0_93] : memref<1x32xf32, #tpu.memory_space<vmem>>, vector<1x32xf32>
    %319 = vector.broadcast %318 : vector<1x32xf32> to vector<2x32xf32>
    %320 = arith.mulf %317, %319 : vector<2x32xf32>
    %cst_94 = arith.constant dense<0.000000e+00> : vector<2xf32>
    %321 = vector.multi_reduction <add>, %320, %cst_94 [1] : vector<2x32xf32> to vector<2xf32>
    %322 = vector.shape_cast %321 : vector<2xf32> to vector<2x1xf32>
    %c0_95 = arith.constant 0 : index
    %c0_96 = arith.constant 0 : index
    %323 = vector.load %arg11[%c0_95, %c0_96] : memref<1x1xf32, #tpu.memory_space<vmem>>, vector<1x1xf32>
    %324 = vector.broadcast %323 : vector<1x1xf32> to vector<2x1xf32>
    %325 = arith.addf %322, %324 : vector<2x1xf32>
    %c0_97 = arith.constant 0 : index
    %c0_98 = arith.constant 0 : index
    %326 = vector.load %arg12[%c0_97, %c0_98] : memref<2x1xf32, #tpu.memory_space<vmem>>, vector<2x1xf32>
    tpu.vector_store %arg12[%c0_97, %c0_98], %325 {strides = array<i32>} : memref<2x1xf32, #tpu.memory_space<vmem>>, vector<2x1xf32>,
    return
  }
}

</mosaic_0001>

<bundles_post_ra>
// kernel: custom_model_forward.1
= control target key start
LH: loop header
LB: loop body
LE: loop exit
PB: predicated region body
PF: predicated region fallthrough
CT: control target
= control target key end

     0   :  { %v2475_v3 = vmov 0.0   ;;  %vm64_vm0 = vcmask 1041409   ;;  %vm66_vm1 = vcmask 130048   ;;  %v51_v44 = vlaneseq  ;;  %s2981_s1 = inlined_call_operand.vmem [shape: f32[16,256], index: 1, kind: input, shape index: {}]   ;;  %s2982_s0 = inlined_call_operand.vmem [shape: f32[2,8,16], index: 0, kind: input, shape index: {}]   ;;  %s2983_s2 = inlined_call_operand.vmem [shape: f32[64,256], index: 2, kind: input, shape index: {}]   ;;  %s2984_s3 = inlined_call_operand.vmem [shape: f32[1,256], index: 3, kind: input, shape index: {}]   ;;  %s2985_s4 = inlined_call_operand.vmem [shape: f32[64,128], index: 4, kind: input, shape index: {}]   ;;  %s2986_s6 = inlined_call_operand.vmem [shape: f32[128,64], index: 6, kind: input, shape index: {}]   ;;  %s2987_s8 = inlined_call_operand.vmem [shape: f32[64,32], index: 8, kind: input, shape index: {}]   ;;  %s2988_s5 = inlined_call_operand.vmem [shape: f32[1,128], index: 5, kind: input, shape index: {}]   ;;  %s2989_s7 = inlined_call_operand.vmem [shape: f32[1,64], index: 7, kind: input, shape index: {}]   ;;  %s2990_s11 = inlined_call_operand.<no memory space> [shape: f32[1,1], index: 11, kind: input, shape index: {}]   ;;  %s2991_s9 = inlined_call_operand.vmem [shape: f32[1,32], index: 9, kind: input, shape index: {}]   ;;  %s2992_s10 = inlined_call_operand.vmem [shape: f32[1,32], index: 10, kind: input, shape index: {}]   ;;  %s2993_s12 = inlined_call_operand.vmem [shape: f32[2,1], index: 12, kind: output, shape index: {}]  }
   0x1   :  { %v46_v0 = vld [vmem:[%s2981_s1 + $0x8] sm:$0xff]  ;;  %v48_v1 = vld [vmem:[%s2981_s1 + $0x18] sm:$0xff]  ;;  %v45_v2 = vld [vmem:[%s2981_s1] sm:$0xff]  ;;  %133 = vmatprep.mubr.f32.mxu0 %v2475_v3  ;;  %220 = vmatprep.mubr.f32.mxu1 %v2475_v3  ;;  %vm794_vm3 = vcmask 523264   ;;  %vm2479_vm4 = vmmov 0   ;;  %vm1994_vm5 = vcmask 254976  }
   0x2   :  { %v2556_v4 = vpack.c.bf16 %v48_v1, %v46_v0  ;;  %v47_v5 = vld [vmem:[%s2981_s1 + $0x10] sm:$0xff]  ;;  %v2564_v6 = vld [vmem:[%s2982_s0] sm:$0xff]  ;;  %v2569_v7 = vld [vmem:[%s2982_s0 + $0x8] sm:$0xff]  ;;  %v52_v45 = vshrl.u32 %v51_v44, 7  ;;  %vm2006_vm6 = vcmask 1024  }
   0x3   :  { %v2571_v8 = vpack.c.bf16 %v47_v5, %v45_v2  ;;  %v63_v9 = vrot.slane %v2569_v7, 7  ;;  %v240_v11 = vrot.slane %v2564_v6, 2  ;;  %v241_v12 = vrot.slane %v2569_v7, 1  ;;  %v775_v16 = vld [vmem:[%s2983_s2 + $0x8] sm:$0xff]  ;;  %v777_v17 = vld [vmem:[%s2983_s2 + $0x18] sm:$0xff]  ;;  %v774_v22 = vld [vmem:[%s2983_s2] sm:$0xff] }
   0x4   :  { %2167 = vmatprep.subr.bf16.mxu0 %v2556_v4  ;;  %2171 = vmatprep.subr.bf16.mxu1 %v2556_v4  ;;  %v418_v14 = vrot.slane %v2564_v6, 4  ;;  %v419_v15 = vrot.slane %v2569_v7, 3  ;;  %v596_v19 = vrot.slane %v2564_v6, 6  ;;  %v597_v20 = vrot.slane %v2569_v7, 5  ;;  %v776_v23 = vld [vmem:[%s2983_s2 + $0x10] sm:$0xff]  ;;  %v779_v24 = vld [vmem:[%s2983_s2 + $0x28] sm:$0xff] }
   0x5   :  { %2169 = vmatpush1.bf16.msra.mxu0 %v2571_v8  ;;  %v65_v10 = vsel %vm64_vm0, %v63_v9, %v2564_v6  ;;  %2173 = vmatpush1.bf16.msra.mxu1 %v2571_v8  ;;  %v242_v13 = vsel %vm64_vm0, %v241_v12, %v240_v11  ;;  %v2604_v21 = vpack.c.bf16 %v777_v17, %v775_v16  ;;  %v781_v25 = vld [vmem:[%s2983_s2 + $0x38] sm:$0xff]  ;;  %v778_v29 = vld [vmem:[%s2983_s2 + $0x20] sm:$0xff]  ;;  %v780_v30 = vld [vmem:[%s2983_s2 + $0x30] sm:$0xff]  ;;  %v53_v46 = vsub.s32 0, %v52_v45 }
   0x6   :  { %2175 = vmatprep.subr.bf16.mxu0 %v2556_v4  ;;  %2179 = vmatprep.subr.bf16.mxu1 %v2556_v4  ;;  %v420_v18 = vsel %vm64_vm0, %v419_v15, %v418_v14  ;;  %v598_v26 = vsel %vm64_vm0, %v597_v20, %v596_v19  ;;  %v2622_v27 = vpack.c.bf16 %v776_v23, %v774_v22  ;;  %v783_v31 = vld [vmem:[%s2983_s2 + $0x48] sm:$0xff]  ;;  %v785_v32 = vld [vmem:[%s2983_s2 + $0x58] sm:$0xff]  ;;  %v782_v35 = vld [vmem:[%s2983_s2 + $0x40] sm:$0xff]  ;;  %v57_v48 = vsub.s32 1, %v52_v45 }
   0x7   :  { %v2625_v28 = vpack.c.bf16 %v781_v25, %v779_v24  ;;  %v2641_v33 = vpack.c.bf16 %v780_v30, %v778_v29  ;;  %v2645_v34 = vpack.c.bf16 %v785_v32, %v783_v31  ;;  %v784_v36 = vld [vmem:[%s2983_s2 + $0x50] sm:$0xff]  ;;  %v787_v37 = vld [vmem:[%s2983_s2 + $0x68] sm:$0xff]  ;;  %v789_v38 = vld [vmem:[%s2983_s2 + $0x78] sm:$0xff]  ;;  %v2476_v12 = vmov 1983009808  }
   0x8   :  { %2012 = vmatmul.mubr.msk.f32.vlgmr.msra.gmra.mrb[0].mxu0 %vm66_vm1, %v65_v10  ;;  %v2660_v39 = vpack.c.bf16 %v784_v36, %v782_v35  ;;  %v2663_v40 = vpack.c.bf16 %v789_v38, %v787_v37  ;;  %v786_v41 = vld [vmem:[%s2983_s2 + $0x60] sm:$0xff]  ;;  %v788_v42 = vld [vmem:[%s2983_s2 + $0x70] sm:$0xff]  ;;  %v2705_v32 = vand.u32 127, %v51_v44 }
   0x9   :  { %2177 = vmatpush1.bf16.msra.mxu0 %v2571_v8  ;;  %309 = vmatprep.mubr.f32.mxu0 %v2475_v3  ;;  %v2672_v43 = vpack.c.bf16 %v788_v42, %v786_v41  ;;  %v49_v47 = vld [vmem:[%s2984_s3] sm:$0x3]  ;;  %s2477_s3 = smov 64   ;;  %v152_v42 = vrot.slane %v2564_v6, 1 }
   0xa   :  { %2183 = vmatprep.subr.bf16.mxu0 %v2556_v4  ;;  %v2690_v49 = vrot.slane %v49_v47, %v53_v46  ;;  %v2692_v50 = vrot.slane %v49_v47, %v57_v48  ;;  %vm792_vm2 = vcmp.lt.s32.totalorder %v2705_v32, 64  ;;  %v330_v46 = vrot.slane %v2569_v7, 2 }
   0xb   :  { %v153_v44 = vsel %vm64_vm0, %v2569_v7, %v152_v42  ;;  %v507_v48 = vrot.slane %v2564_v6, 5 }
   0xc   :  { %2016 = vmatmul.mubr.msk.f32.vlgmr.msra.gmra.mrb[2].mxu0 %vm66_vm1, %v242_v13  ;;  %v873_v13 = vunpack.c.l.s4 %v2476_v12  ;;  %2014 = vmatmul.mubr.msk.f32.vlgmr.msra.gmra.mrb[0].mxu1 %vm66_vm1, %v153_v44 }
   0xd   :  { %2185 = vmatpush1.bf16.msra.mxu0 %v2571_v8  ;;  %487 = vmatprep.mubr.f32.mxu0 %v2475_v3 }
   0xe   :  { %2191 = vmatprep.subr.bf16.mxu0 %v2556_v4  ;;  %v874_v14 = vunpack.c.0.s8 %v873_v13  ;;  %2181 = vmatpush1.bf16.msra.mxu1 %v2571_v8 }
   0xf   :  { %398 = vmatprep.mubr.f32.mxu1 %v2475_v3  ;;  %2187 = vmatprep.subr.bf16.mxu1 %v2556_v4 }
  0x10   :  { %2020 = vmatmul.mubr.msk.f32.vlgmr.msra.gmra.mrb[4].mxu0 %vm66_vm1, %v420_v18  ;;  %v2702_v16 = vsub.s32 %v874_v14, %v52_v45  ;;  %v329_v45 = vrot.slane %v2564_v6, 3 }
  0x11   :  { %2193 = vmatpush1.bf16.msra.mxu0 %v2571_v8  ;;  %665 = vmatprep.mubr.f32.mxu0 %v2475_v3 }
  0x12   :  { %2199 = vmatprep.subr.bf16.mxu0 %v2604_v21  ;;  %v331_v47 = vsel %vm64_vm0, %v330_v46, %v329_v45 }
  0x13   :  { %2018 = vmatmul.mubr.msk.f32.vlgmr.msra.gmra.mrb[2].mxu1 %vm66_vm1, %v331_v47 }
  0x14   :  { %2024 = vmatmul.mubr.msk.f32.vlgmr.msra.gmra.mrb[6].mxu0 %vm66_vm1, %v598_v26  ;;  %2189 = vmatpush1.bf16.msra.mxu1 %v2571_v8 }
  0x15   :  { %2201 = vmatpush1.bf16.msra.mxu0 %v2622_v27  ;;  %862 = vmatprep.mubr.f32.mxu0 %v2475_v3 }
  0x16   :  { %2203 = vmatprep.subr.bf16.mxu0 %v2625_v28  ;;  %576 = vmatprep.mubr.f32.mxu1 %v2475_v3 }
  0x17   :  { %2195 = vmatprep.subr.bf16.mxu1 %v2556_v4 }
  0x19   :  { %2205 = vmatpush1.bf16.msra.mxu0 %v2641_v33 }
  0x1a   :  { %2207 = vmatprep.subr.bf16.mxu0 %v2645_v34 }
  0x1d   :  { %2209 = vmatpush1.bf16.msra.mxu0 %v2660_v39 }
  0x1e   :  { %2211 = vmatprep.subr.bf16.mxu0 %v2663_v40 }
  0x21   :  { %2213 = vmatpush1.bf16.msra.mxu0 %v2672_v43 }
  0x22   :  { %2231 = vmatprep.subr.bf16.mxu0 %v2604_v21 }
  0x24   :  { %863 = vmatmul.mubr.f32.vlgmr.msra.gmra.mrb[8].mxu0 %v2475_v3 }
  0x25   :  { %2233 = vmatpush1.bf16.msra.mxu0 %v2622_v27  ;;  %1092 = vmatprep.mubr.f32.mxu0 %v2475_v3 }
  0x26   :  { %2235 = vmatprep.subr.bf16.mxu0 %v2625_v28 }
  0x29   :  { %2237 = vmatpush1.bf16.msra.mxu0 %v2641_v33 }
  0x2a   :  { %2239 = vmatprep.subr.bf16.mxu0 %v2645_v34 }
  0x2d   :  { %2241 = vmatpush1.bf16.msra.mxu0 %v2660_v39 }
  0x2e   :  { %2243 = vmatprep.subr.bf16.mxu0 %v2663_v40 }
  0x31   :  { %2245 = vmatpush1.bf16.msra.mxu0 %v2672_v43 }
  0x32   :  { %2263 = vmatprep.subr.bf16.mxu0 %v2604_v21 }
  0xdb   :  { %v135_v51 = vpop.f32.mrb[0].mxu0 }
  0xdc   :  { %v136_v52 = vadd.f32 %v135_v51, %v2690_v49  ;;  %v137_v53 = vpop.f32.mrb[1].mxu0  ;;  %v508_v51 = vrot.slane %v2569_v7, 4 }
  0xdd   :  { %v138_v54 = vadd.f32 %v137_v53, %v2692_v50  ;;  %v685_v53 = vrot.slane %v2564_v6, 7 }
  0xdf   :  { %v142_v55 = vcombine.low %v136_v52, %v138_v54  ;;  %v311_v56 = vpop.f32.mrb[2].mxu0  ;;  %v509_v52 = vsel %vm64_vm0, %v508_v51, %v507_v48  ;;  %v686_v54 = vrot.slane %v2569_v7, 6 }
  0xe0   :  { %v312_v57 = vadd.f32 %v311_v56, %v2690_v49  ;;  %v313_v58 = vpop.f32.mrb[3].mxu0  ;;  %2022 = vmatmul.mubr.msk.f32.vlgmr.msra.gmra.mrb[4].mxu1 %vm66_vm1, %v509_v52 }
  0xe1   :  { %2013 = vst.sshfl [vmem:[#allocation2] sm:$0x33 pattern:$0x76325410] %v142_v55  ;;  %v314_v59 = vadd.f32 %v313_v58, %v2692_v50  ;;  %2197 = vmatpush1.bf16.msra.mxu1 %v2571_v8  ;;  %754 = vmatprep.mubr.f32.mxu1 %v2475_v3  ;;  %v687_v55 = vsel %vm64_vm0, %v686_v54, %v685_v53 }
  0xe2   :  { %2215 = vmatprep.subr.bf16.mxu1 %v2604_v21 }
  0xe3   :  { %v318_v60 = vcombine.low %v312_v57, %v314_v59  ;;  %v489_v61 = vpop.f32.mrb[4].mxu0  ;;  %v222_v57 = vpop.f32.mrb[0].mxu1 }
  0xe4   :  { %v490_v62 = vadd.f32 %v489_v61, %v2690_v49  ;;  %v491_v63 = vpop.f32.mrb[5].mxu0  ;;  %2026 = vmatmul.mubr.msk.f32.vlgmr.msra.gmra.mrb[6].mxu1 %vm66_vm1, %v687_v55  ;;  %v223_v58 = vadd.f32 %v222_v57, %v2690_v49  ;;  %v224_v59 = vpop.f32.mrb[1].mxu1 }
  0xe5   :  { %2017 = vst.sshfl [vmem:[#allocation2 + $0x8] sm:$0x33 pattern:$0x76325410] %v318_v60  ;;  %v492_v0 = vadd.f32 %v491_v63, %v2692_v50  ;;  %2217 = vmatpush1.bf16.msra.mxu1 %v2622_v27  ;;  %977 = vmatprep.mubr.f32.mxu1 %v2475_v3  ;;  %v225_v60 = vadd.f32 %v224_v59, %v2692_v50 }
  0xe6   :  { %2219 = vmatprep.subr.bf16.mxu1 %v2625_v28 }
  0xe7   :  { %v496_v1 = vcombine.low %v490_v62, %v492_v0  ;;  %v667_v2 = vpop.f32.mrb[6].mxu0  ;;  %v229_v61 = vcombine.low %v223_v58, %v225_v60  ;;  %v400_v62 = vpop.f32.mrb[2].mxu1 }
  0xe8   :  { %v668_v5 = vadd.f32 %v667_v2, %v2690_v49  ;;  %v669_v9 = vpop.f32.mrb[7].mxu0  ;;  %v793_v20 = vld [vmem:[#allocation2] sm:$0xf]  ;;  %v401_v63 = vadd.f32 %v400_v62, %v2690_v49  ;;  %v402_v0 = vpop.f32.mrb[3].mxu1 }
  0xe9   :  { %2021 = vst.sshfl [vmem:[#allocation2 + $0x10] sm:$0x33 pattern:$0x76325410] %v496_v1  ;;  %v670_v10 = vadd.f32 %v669_v9, %v2692_v50  ;;  %2221 = vmatpush1.bf16.msra.mxu1 %v2641_v33  ;;  %v403_v1 = vadd.f32 %v402_v0, %v2692_v50 }
  0xea   :  { %2223 = vmatprep.subr.bf16.mxu1 %v2645_v34  ;;  %2015 = vst.sshfl [vmem:[#allocation2 + $0x4] sm:$0x33 pattern:$0x76325410] %v229_v61 }
  0xeb   :  { %v674_v11 = vcombine.low %v668_v5, %v670_v10  ;;  %v407_v2 = vcombine.low %v401_v63, %v403_v1 }
  0xed   :  { %2025 = vst.sshfl [vmem:[#allocation2 + $0x18] sm:$0x33 pattern:$0x76325410] %v674_v11  ;;  %2225 = vmatpush1.bf16.msra.mxu1 %v2660_v39 }
  0xee   :  { %2227 = vmatprep.subr.bf16.mxu1 %v2663_v40  ;;  %2019 = vst.sshfl [vmem:[#allocation2 + $0xc] sm:$0x33 pattern:$0x76325410] %v407_v2 }
  0xf1   :  { %2229 = vmatpush1.bf16.msra.mxu1 %v2672_v43 }
  0xf2   :  { %2247 = vmatprep.subr.bf16.mxu1 %v2604_v21 }
  0xf7   :  { %v864_v15 = vpop.f32.mrb[8].mxu0 }
  0xf8   :  { %v866_v17 = vpop.f32.mrb[9].mxu0 }
  0xf9   :  { %v871_v18 = vcombine.low %v864_v15, %v866_v17 }
  0xfb   :  { %v878_v19 = vrot.slane %v871_v18, %v2702_v16 }
  0xfd   :  { %v880_v22 = vadd.f32 %v878_v19, %v793_v20 }
  0xff   :  { %v2028_v23 = vmul.f32 -1.442695, %v880_v22  ;;  %v888_v24 = vrot.slane %v880_v22, 2 }
 0x101   :  { %2379 = vpow2.f32 %v2028_v23  ;;  %v2029_v25 = vmul.f32 -1.442695, %v888_v24  ;;  %v907_v23 = vld [vmem:[#allocation2 + $0x4] sm:$0xf] }
 0x103   :  { %2381 = vpow2.f32 %v2029_v25 }
 0x104   :  { %2383 = vtanh.f32 %v888_v24 }
 0x10b   :  { %v2380_v26 = vpop.eup %2379 }
 0x10c   :  { %v884_v30 = vadd.f32 1.0, %v2380_v26 }
 0x10d   :  { %v2382_v29 = vpop.eup %2381 }
 0x10e   :  { %v894_v31 = vadd.f32 1.0, %v2382_v29  ;;  %v2384_v35 = vpop.eup %2383 }
 0x110   :  { %2385 = vrcp.f32 %v894_v31 }
 0x111   :  { %2387 = vrcp.f32 %v884_v30 }
 0x11a   :  { %v2386_v36 = vpop.eup %2385 }
 0x11b   :  { %v2388_v37 = vpop.eup %2387  ;;  %v897_v38 = vsel %vm792_vm2, %v2384_v35, %v2386_v36 }
 0x11c   :  { %v898_v41 = vmul.f32 %v2388_v37, %v897_v38  ;;  %v899_v4 = vmul.f32 0.0, %v2388_v37 }
 0x11e   :  { %901 = vrot.lane.b32.xlu0 %v898_v41, %s2477_s3 }
 0x190   :  { %v902_v6 = vpop.permute.xlu0 %901 }
 0x191   :  { %v2745_v7 = vadd.f32 %v902_v6, %v899_v4  ;;  %v1022_v6 = vld [vmem:[#allocation2 + $0x8] sm:$0xf] }
 0x193   :  { %2389 = vtanh.f32 %v2745_v7 }
 0x19d   :  { %v2390_v8 = vpop.eup %2389 }
 0x19e   :  { %v906_v56 = vmul.f32 %v2390_v8, %v897_v38 }
 0x1a0   :  { %909 = vrot.lane.b32.xlu0 %v906_v56, %s2477_s3 }
 0x1b3   :  { %v578_v5 = vpop.f32.mrb[4].mxu1 }
 0x1b4   :  { %v579_v9 = vadd.f32 %v578_v5, %v2690_v49  ;;  %v580_v10 = vpop.f32.mrb[5].mxu1 }
 0x1b5   :  { %v581_v11 = vadd.f32 %v580_v10, %v2692_v50 }
 0x1b7   :  { %v585_v12 = vcombine.low %v579_v9, %v581_v11  ;;  %v756_v13 = vpop.f32.mrb[6].mxu1 }
 0x1b8   :  { %v757_v14 = vadd.f32 %v756_v13, %v2690_v49  ;;  %v758_v15 = vpop.f32.mrb[7].mxu1 }
 0x1b9   :  { %2023 = vst.sshfl [vmem:[#allocation2 + $0x14] sm:$0x33 pattern:$0x76325410] %v585_v12  ;;  %v759_v17 = vadd.f32 %v758_v15, %v2692_v50 }
 0x1bb   :  { %v763_v18 = vcombine.low %v757_v14, %v759_v17 }
 0x1bd   :  { %2027 = vst.sshfl [vmem:[#allocation2 + $0x1c] sm:$0x33 pattern:$0x76325410] %v763_v18 }
 0x212   :  { %v910_v19 = vpop.permute.xlu0 %909 }
 0x213   :  { %2030 = vmatmul.mubr.msk.f32.vlgmr.msra.gmra.mrb[8].mxu1 %vm794_vm3, %v910_v19  ;;  %v1137_v19 = vld [vmem:[#allocation2 + $0xc] sm:$0xf] }
 0x214   :  { %2249 = vmatpush1.bf16.msra.mxu1 %v2622_v27  ;;  %1207 = vmatprep.mubr.f32.mxu1 %v2475_v3 }
 0x215   :  { %2251 = vmatprep.subr.bf16.mxu1 %v2625_v28 }
 0x218   :  { %2253 = vmatpush1.bf16.msra.mxu1 %v2641_v33 }
 0x219   :  { %2255 = vmatprep.subr.bf16.mxu1 %v2645_v34 }
 0x21c   :  { %2257 = vmatpush1.bf16.msra.mxu1 %v2660_v39 }
 0x21d   :  { %2259 = vmatprep.subr.bf16.mxu1 %v2663_v40 }
 0x220   :  { %2261 = vmatpush1.bf16.msra.mxu1 %v2672_v43 }
 0x221   :  { %2279 = vmatprep.subr.bf16.mxu1 %v2604_v21 }
 0x2e6   :  { %v979_v49 = vpop.f32.mrb[8].mxu1 }
 0x2e7   :  { %v981_v50 = vpop.f32.mrb[9].mxu1 }
 0x2e8   :  { %v986_v20 = vcombine.low %v979_v49, %v981_v50 }
 0x2ea   :  { %v993_v22 = vrot.slane %v986_v20, %v2702_v16 }
 0x2ec   :  { %v995_v24 = vadd.f32 %v993_v22, %v907_v23 }
 0x2ee   :  { %v2031_v25 = vmul.f32 -1.442695, %v995_v24  ;;  %v1003_v26 = vrot.slane %v995_v24, 2 }
 0x2f0   :  { %2391 = vpow2.f32 %v2031_v25  ;;  %v2032_v29 = vmul.f32 -1.442695, %v1003_v26 }
 0x2f2   :  { %2393 = vpow2.f32 %v2032_v29 }
 0x2f3   :  { %2395 = vtanh.f32 %v1003_v26 }
 0x2fa   :  { %v2392_v30 = vpop.eup %2391 }
 0x2fb   :  { %v999_v35 = vadd.f32 1.0, %v2392_v30 }
 0x2fc   :  { %v2394_v31 = vpop.eup %2393 }
 0x2fd   :  { %v1009_v36 = vadd.f32 1.0, %v2394_v31  ;;  %v2396_v37 = vpop.eup %2395 }
 0x2ff   :  { %2397 = vrcp.f32 %v1009_v36 }
 0x300   :  { %2399 = vrcp.f32 %v999_v35 }
 0x309   :  { %v2398_v38 = vpop.eup %2397 }
 0x30a   :  { %v2400_v41 = vpop.eup %2399  ;;  %v1012_v42 = vsel %vm792_vm2, %v2396_v37, %v2398_v38 }
 0x30b   :  { %v1013_v45 = vmul.f32 %v2400_v41, %v1012_v42  ;;  %v1014_v46 = vmul.f32 %v2400_v41, %v2745_v7 }
 0x30d   :  { %1016 = vrot.lane.b32.xlu1 %v1013_v45, %s2477_s3 }
 0x37f   :  { %v1017_v44 = vpop.permute.xlu1 %1016 }
 0x380   :  { %v1019_v47 = vadd.f32 %v1017_v44, %v1014_v46 }
 0x382   :  { %2401 = vtanh.f32 %v1019_v47 }
 0x38c   :  { %v2402_v48 = vpop.eup %2401 }
 0x38d   :  { %v1021_v51 = vmul.f32 %v2402_v48, %v1012_v42 }
 0x38f   :  { %1024 = vrot.lane.b32.xlu1 %v1021_v51, %s2477_s3  ;;  %v1252_v51 = vld [vmem:[#allocation2 + $0x10] sm:$0xf] }
 0x401   :  { %v1025_v52 = vpop.permute.xlu1 %1024 }
 0x402   :  { %2033 = vmatmul.mubr.msk.f32.vlgmr.msra.gmra.mrb[10].mxu0 %vm794_vm3, %v1025_v52 }
 0x403   :  { %2265 = vmatpush1.bf16.msra.mxu0 %v2622_v27  ;;  %1322 = vmatprep.mubr.f32.mxu0 %v2475_v3 }
 0x404   :  { %2267 = vmatprep.subr.bf16.mxu0 %v2625_v28 }
 0x407   :  { %2269 = vmatpush1.bf16.msra.mxu0 %v2641_v33 }
 0x408   :  { %2271 = vmatprep.subr.bf16.mxu0 %v2645_v34 }
 0x40b   :  { %2273 = vmatpush1.bf16.msra.mxu0 %v2660_v39 }
 0x40c   :  { %2275 = vmatprep.subr.bf16.mxu0 %v2663_v40 }
 0x40f   :  { %2277 = vmatpush1.bf16.msra.mxu0 %v2672_v43 }
 0x410   :  { %2295 = vmatprep.subr.bf16.mxu0 %v2604_v21 }
 0x4d5   :  { %v1094_v53 = vpop.f32.mrb[10].mxu0 }
 0x4d6   :  { %v1096_v54 = vpop.f32.mrb[11].mxu0 }
 0x4d7   :  { %v1101_v55 = vcombine.low %v1094_v53, %v1096_v54 }
 0x4d9   :  { %v1108_v4 = vrot.slane %v1101_v55, %v2702_v16 }
 0x4db   :  { %v1110_v7 = vadd.f32 %v1108_v4, %v1022_v6 }
 0x4dd   :  { %v2034_v8 = vmul.f32 -1.442695, %v1110_v7  ;;  %v1118_v56 = vrot.slane %v1110_v7, 2 }
 0x4df   :  { %2403 = vpow2.f32 %v2034_v8  ;;  %v2035_v57 = vmul.f32 -1.442695, %v1118_v56 }
 0x4e1   :  { %2405 = vpow2.f32 %v2035_v57 }
 0x4e2   :  { %2407 = vtanh.f32 %v1118_v56 }
 0x4e9   :  { %v2404_v58 = vpop.eup %2403 }
 0x4ea   :  { %v1114_v60 = vadd.f32 1.0, %v2404_v58 }
 0x4eb   :  { %v2406_v59 = vpop.eup %2405 }
 0x4ec   :  { %v1124_v61 = vadd.f32 1.0, %v2406_v59  ;;  %v2408_v62 = vpop.eup %2407 }
 0x4ee   :  { %2409 = vrcp.f32 %v1124_v61 }
 0x4ef   :  { %2411 = vrcp.f32 %v1114_v60 }
 0x4f8   :  { %v2410_v63 = vpop.eup %2409 }
 0x4f9   :  { %v2412_v0 = vpop.eup %2411  ;;  %v1127_v1 = vsel %vm792_vm2, %v2408_v62, %v2410_v63 }
 0x4fa   :  { %v1128_v2 = vmul.f32 %v2412_v0, %v1127_v1  ;;  %v1129_v5 = vmul.f32 %v2412_v0, %v1019_v47 }
 0x4fc   :  { %1131 = vrot.lane.b32.xlu0 %v1128_v2, %s2477_s3 }
 0x56e   :  { %v1132_v9 = vpop.permute.xlu0 %1131 }
 0x56f   :  { %v1134_v10 = vadd.f32 %v1132_v9, %v1129_v5 }
 0x571   :  { %2413 = vtanh.f32 %v1134_v10 }
 0x57b   :  { %v2414_v11 = vpop.eup %2413 }
 0x57c   :  { %v1136_v12 = vmul.f32 %v2414_v11, %v1127_v1 }
 0x57e   :  { %1139 = vrot.lane.b32.xlu1 %v1136_v12, %s2477_s3 }
 0x5f0   :  { %v1140_v13 = vpop.permute.xlu1 %1139 }
 0x5f1   :  { %2036 = vmatmul.mubr.msk.f32.vlgmr.msra.gmra.mrb[10].mxu1 %vm794_vm3, %v1140_v13 }
 0x5f2   :  { %2281 = vmatpush1.bf16.msra.mxu1 %v2622_v27  ;;  %1437 = vmatprep.mubr.f32.mxu1 %v2475_v3 }
 0x5f3   :  { %2283 = vmatprep.subr.bf16.mxu1 %v2625_v28 }
 0x5f6   :  { %2285 = vmatpush1.bf16.msra.mxu1 %v2641_v33 }
 0x5f7   :  { %2287 = vmatprep.subr.bf16.mxu1 %v2645_v34 }
 0x5fa   :  { %2289 = vmatpush1.bf16.msra.mxu1 %v2660_v39 }
 0x5fb   :  { %2291 = vmatprep.subr.bf16.mxu1 %v2663_v40 }
 0x5fe   :  { %2293 = vmatpush1.bf16.msra.mxu1 %v2672_v43 }
 0x5ff   :  { %2311 = vmatprep.subr.bf16.mxu1 %v2604_v21 }
 0x6c4   :  { %v1209_v14 = vpop.f32.mrb[10].mxu1 }
 0x6c5   :  { %v1211_v15 = vpop.f32.mrb[11].mxu1 }
 0x6c6   :  { %v1216_v17 = vcombine.low %v1209_v14, %v1211_v15 }
 0x6c8   :  { %v1223_v18 = vrot.slane %v1216_v17, %v2702_v16 }
 0x6ca   :  { %v1225_v49 = vadd.f32 %v1223_v18, %v1137_v19 }
 0x6cc   :  { %v2037_v50 = vmul.f32 -1.442695, %v1225_v49  ;;  %v1233_v20 = vrot.slane %v1225_v49, 2 }
 0x6ce   :  { %2415 = vpow2.f32 %v2037_v50  ;;  %v2038_v22 = vmul.f32 -1.442695, %v1233_v20 }
 0x6d0   :  { %2417 = vpow2.f32 %v2038_v22 }
 0x6d1   :  { %2419 = vtanh.f32 %v1233_v20 }
 0x6d8   :  { %v2416_v23 = vpop.eup %2415 }
 0x6d9   :  { %v1229_v25 = vadd.f32 1.0, %v2416_v23 }
 0x6da   :  { %v2418_v24 = vpop.eup %2417 }
 0x6db   :  { %v1239_v26 = vadd.f32 1.0, %v2418_v24  ;;  %v2420_v21 = vpop.eup %2419 }
 0x6dd   :  { %2421 = vrcp.f32 %v1239_v26 }
 0x6de   :  { %2423 = vrcp.f32 %v1229_v25 }
 0x6e7   :  { %v2422_v29 = vpop.eup %2421 }
 0x6e8   :  { %v2424_v30 = vpop.eup %2423  ;;  %v1242_v31 = vsel %vm792_vm2, %v2420_v21, %v2422_v29 }
 0x6e9   :  { %v1243_v35 = vmul.f32 %v2424_v30, %v1242_v31  ;;  %v1244_v36 = vmul.f32 %v2424_v30, %v1134_v10  ;;  %v1482_v30 = vld [vmem:[#allocation2 + $0x18] sm:$0xf] }
 0x6eb   :  { %1246 = vrot.lane.b32.xlu0 %v1243_v35, %s2477_s3 }
 0x75d   :  { %v1247_v37 = vpop.permute.xlu0 %1246 }
 0x75e   :  { %v1249_v38 = vadd.f32 %v1247_v37, %v1244_v36 }
 0x760   :  { %2425 = vtanh.f32 %v1249_v38 }
 0x76a   :  { %v2426_v41 = vpop.eup %2425 }
 0x76b   :  { %v1251_v42 = vmul.f32 %v2426_v41, %v1242_v31 }
 0x76d   :  { %1254 = vrot.lane.b32.xlu1 %v1251_v42, %s2477_s3 }
 0x7df   :  { %v1255_v45 = vpop.permute.xlu1 %1254 }
 0x7e0   :  { %2039 = vmatmul.mubr.msk.f32.vlgmr.msra.gmra.mrb[12].mxu0 %vm794_vm3, %v1255_v45 }
 0x7e1   :  { %2297 = vmatpush1.bf16.msra.mxu0 %v2622_v27  ;;  %1552 = vmatprep.mubr.f32.mxu0 %v2475_v3 }
 0x7e2   :  { %2299 = vmatprep.subr.bf16.mxu0 %v2625_v28 }
 0x7e5   :  { %2301 = vmatpush1.bf16.msra.mxu0 %v2641_v33 }
 0x7e6   :  { %2303 = vmatprep.subr.bf16.mxu0 %v2645_v34 }
 0x7e9   :  { %2305 = vmatpush1.bf16.msra.mxu0 %v2660_v39 }
 0x7ea   :  { %2307 = vmatprep.subr.bf16.mxu0 %v2663_v40 }
 0x7ed   :  { %2309 = vmatpush1.bf16.msra.mxu0 %v2672_v43 }
 0x8b3   :  { %v1324_v46 = vpop.f32.mrb[12].mxu0 }
 0x8b4   :  { %v1326_v44 = vpop.f32.mrb[13].mxu0 }
 0x8b5   :  { %v1331_v47 = vcombine.low %v1324_v46, %v1326_v44 }
 0x8b7   :  { %v1338_v48 = vrot.slane %v1331_v47, %v2702_v16 }
 0x8b9   :  { %v1340_v52 = vadd.f32 %v1338_v48, %v1252_v51 }
 0x8bb   :  { %v2040_v53 = vmul.f32 -1.442695, %v1340_v52  ;;  %v1348_v54 = vrot.slane %v1340_v52, 2 }
 0x8bd   :  { %2427 = vpow2.f32 %v2040_v53  ;;  %v2041_v55 = vmul.f32 -1.442695, %v1348_v54 }
 0x8bf   :  { %2429 = vpow2.f32 %v2041_v55 }
 0x8c0   :  { %2431 = vtanh.f32 %v1348_v54 }
 0x8c7   :  { %v2428_v4 = vpop.eup %2427 }
 0x8c8   :  { %v1344_v7 = vadd.f32 1.0, %v2428_v4 }
 0x8c9   :  { %v2430_v6 = vpop.eup %2429 }
 0x8ca   :  { %v1354_v8 = vadd.f32 1.0, %v2430_v6  ;;  %v2432_v56 = vpop.eup %2431 }
 0x8cc   :  { %2433 = vrcp.f32 %v1354_v8 }
 0x8cd   :  { %2435 = vrcp.f32 %v1344_v7 }
 0x8d6   :  { %v2434_v57 = vpop.eup %2433 }
 0x8d7   :  { %v2436_v58 = vpop.eup %2435  ;;  %v1357_v59 = vsel %vm792_vm2, %v2432_v56, %v2434_v57 }
 0x8d8   :  { %v1358_v60 = vmul.f32 %v2436_v58, %v1357_v59  ;;  %v1359_v61 = vmul.f32 %v2436_v58, %v1249_v38  ;;  %v1597_v58 = vld [vmem:[#allocation2 + $0x1c] sm:$0xf] }
 0x8da   :  { %1361 = vrot.lane.b32.xlu0 %v1358_v60, %s2477_s3 }
 0x94c   :  { %v1362_v62 = vpop.permute.xlu0 %1361 }
 0x94d   :  { %v1364_v63 = vadd.f32 %v1362_v62, %v1359_v61 }
 0x94f   :  { %2437 = vtanh.f32 %v1364_v63 }
 0x959   :  { %v2438_v0 = vpop.eup %2437 }
 0x95a   :  { %v1366_v1 = vmul.f32 %v2438_v0, %v1357_v59 }
 0x95c   :  { %1369 = vrot.lane.b32.xlu1 %v1366_v1, %s2477_s3 }
 0x9ce   :  { %v1370_v2 = vpop.permute.xlu1 %1369 }
 0x9cf   :  { %2042 = vmatmul.mubr.msk.f32.vlgmr.msra.gmra.mrb[12].mxu1 %vm794_vm3, %v1370_v2 }
 0x9d0   :  { %2313 = vmatpush1.bf16.msra.mxu1 %v2622_v27  ;;  %1667 = vmatprep.mubr.f32.mxu1 %v2475_v3  ;;  %v1367_v27 = vld [vmem:[#allocation2 + $0x14] sm:$0xf] }
 0x9d1   :  { %2315 = vmatprep.subr.bf16.mxu1 %v2625_v28 }
 0x9d4   :  { %2317 = vmatpush1.bf16.msra.mxu1 %v2641_v33 }
 0x9d5   :  { %2319 = vmatprep.subr.bf16.mxu1 %v2645_v34 }
 0x9d8   :  { %2321 = vmatpush1.bf16.msra.mxu1 %v2660_v39 }
 0x9d9   :  { %2323 = vmatprep.subr.bf16.mxu1 %v2663_v40 }
 0x9dc   :  { %2325 = vmatpush1.bf16.msra.mxu1 %v2672_v43 }
 0xaa2   :  { %v1439_v5 = vpop.f32.mrb[12].mxu1 }
 0xaa3   :  { %v1441_v9 = vpop.f32.mrb[13].mxu1 }
 0xaa4   :  { %v1446_v10 = vcombine.low %v1439_v5, %v1441_v9 }
 0xaa6   :  { %v1453_v11 = vrot.slane %v1446_v10, %v2702_v16 }
 0xaa8   :  { %v1455_v12 = vadd.f32 %v1453_v11, %v1367_v27  ;;  %v2478_v27 = vmov 0.0|0.0  }
 0xaa9   :  { %2326 = vmatprep.subr.bf16.mxu0 %v2478_v27  ;;  %2338 = vmatprep.subr.bf16.mxu1 %v2478_v27 }
 0xaaa   :  { %v2043_v13 = vmul.f32 -1.442695, %v1455_v12  ;;  %v1463_v14 = vrot.slane %v1455_v12, 2  ;;  %v1712_v12 = vld [vmem:[%s2985_s4] sm:$0xff] }
 0xaac   :  { %2439 = vpow2.f32 %v2043_v13  ;;  %v2044_v28 = vmul.f32 -1.442695, %v1463_v14  ;;  %v1713_v13 = vld [vmem:[%s2985_s4 + $0x8] sm:$0xff] }
 0xaad   :  { %v2327_v32 = vpack.c.bf16 %v1713_v13, %v1712_v12  ;;  %v17_v12 = vstv %s2990_s11  ;;  %v2054_v13 = vld [vmem:[%s2991_s9] ss:$0 sm:$0xff] }
 0xaae   :  { %2441 = vpow2.f32 %v2044_v28  ;;  %v1715_v28 = vld [vmem:[%s2985_s4 + $0x18] sm:$0xff]  ;;  %18 = vst [vmem:[#allocation3] sm:$0x1] %v17_v12 }
 0xaaf   :  { %2443 = vtanh.f32 %v1463_v14  ;;  %v1714_v14 = vld [vmem:[%s2985_s4 + $0x10] sm:$0xff] }
 0xab6   :  { %v2440_v33 = vpop.eup %2439 }
 0xab7   :  { %v1459_v15 = vadd.f32 1.0, %v2440_v33  ;;  %v2330_v33 = vpack.c.bf16 %v1715_v28, %v1714_v14 }
 0xab8   :  { %v2442_v34 = vpop.eup %2441 }
 0xab9   :  { %v1469_v39 = vadd.f32 1.0, %v2442_v34  ;;  %v2444_v40 = vpop.eup %2443  ;;  %v1716_v34 = vld [vmem:[%s2985_s4 + $0x20] sm:$0xff] }
 0xabb   :  { %2445 = vrcp.f32 %v1469_v39 }
 0xabc   :  { %2447 = vrcp.f32 %v1459_v15  ;;  %v1717_v15 = vld [vmem:[%s2985_s4 + $0x28] sm:$0xff] }
 0xabd   :  { %v2333_v39 = vpack.c.bf16 %v1717_v15, %v1716_v34 }
 0xac5   :  { %v2446_v43 = vpop.eup %2445 }
 0xac6   :  { %v2448_v17 = vpop.eup %2447  ;;  %v1472_v18 = vsel %vm792_vm2, %v2444_v40, %v2446_v43  ;;  %v1718_v40 = vld [vmem:[%s2985_s4 + $0x30] sm:$0xff]  ;;  %v1719_v43 = vld [vmem:[%s2985_s4 + $0x38] sm:$0xff] }
 0xac7   :  { %v1473_v19 = vmul.f32 %v2448_v17, %v1472_v18  ;;  %v1474_v49 = vmul.f32 %v2448_v17, %v1364_v63  ;;  %v2336_v17 = vpack.c.bf16 %v1719_v43, %v1718_v40  ;;  %v2057_v40 = vld [vmem:[#allocation3] ss:$0 sm:$0xff] }
 0xac9   :  { %1476 = vrot.lane.b32.xlu0 %v1473_v19, %s2477_s3 }
 0xb3b   :  { %v1477_v50 = vpop.permute.xlu0 %1476 }
 0xb3c   :  { %v1479_v20 = vadd.f32 %v1477_v50, %v1474_v49  ;;  %v1803_v50 = vld [vmem:[%s2986_s6] sm:$0xff] }
 0xb3e   :  { %2449 = vtanh.f32 %v1479_v20 }
 0xb48   :  { %v2450_v22 = vpop.eup %2449 }
 0xb49   :  { %v1481_v23 = vmul.f32 %v2450_v22, %v1472_v18  ;;  %v1805_v22 = vld [vmem:[%s2986_s6 + $0x10] sm:$0xff] }
 0xb4b   :  { %1484 = vrot.lane.b32.xlu1 %v1481_v23, %s2477_s3 }
 0xbbd   :  { %v1485_v24 = vpop.permute.xlu1 %1484 }
 0xbbe   :  { %2045 = vmatmul.mubr.msk.f32.vlgmr.msra.gmra.mrb[14].mxu0 %vm794_vm3, %v1485_v24  ;;  %v1806_v24 = vld [vmem:[%s2986_s6 + $0x18] sm:$0xff] }
 0xbbf   :  { %2109 = vmatprep.mubr.msk.f32.mxu0 %vm2479_vm4, %v2475_v3  ;;  %2328 = vmatpush3.bf16.msra.mxu0 %v2327_v32 }
 0xbc0   :  { %2329 = vmatprep.subr.bf16.mxu0 %v2478_v27 }
 0xbc3   :  { %2331 = vmatpush3.bf16.msra.mxu0 %v2330_v33  ;;  %v2056_v33 = vld [vmem:[%s2992_s10] ss:$0 sm:$0xff] }
 0xbc4   :  { %2332 = vmatprep.subr.bf16.mxu0 %v2478_v27 }
 0xbc7   :  { %2334 = vmatpush3.bf16.msra.mxu0 %v2333_v39 }
 0xbc8   :  { %2335 = vmatprep.subr.bf16.mxu0 %v2478_v27 }
 0xbcb   :  { %2337 = vmatpush3.bf16.msra.mxu0 %v2336_v17 }
 0xbcc   :  { %2362 = vmatprep.subr.bf16.mxu0 %v2478_v27 }
 0xc91   :  { %v1554_v25 = vpop.f32.mrb[14].mxu0 }
 0xc92   :  { %v1556_v26 = vpop.f32.mrb[15].mxu0 }
 0xc93   :  { %v1561_v21 = vcombine.low %v1554_v25, %v1556_v26  ;;  %v2342_v25 = vpack.c.bf16 %v1806_v24, %v1805_v22  ;;  %v1807_v26 = vld [vmem:[%s2986_s6 + $0x20] sm:$0xff] }
 0xc95   :  { %v1568_v29 = vrot.slane %v1561_v21, %v2702_v16  ;;  %v1808_v21 = vld [vmem:[%s2986_s6 + $0x28] sm:$0xff] }
 0xc97   :  { %v1570_v31 = vadd.f32 %v1568_v29, %v1482_v30  ;;  %v2345_v29 = vpack.c.bf16 %v1808_v21, %v1807_v26  ;;  %v1809_v30 = vld [vmem:[%s2986_s6 + $0x30] sm:$0xff] }
 0xc99   :  { %v2046_v35 = vmul.f32 -1.442695, %v1570_v31  ;;  %v1578_v36 = vrot.slane %v1570_v31, 2  ;;  %v1810_v31 = vld [vmem:[%s2986_s6 + $0x38] sm:$0xff] }
 0xc9b   :  { %2451 = vpow2.f32 %v2046_v35  ;;  %v2047_v37 = vmul.f32 -1.442695, %v1578_v36 }
 0xc9d   :  { %2453 = vpow2.f32 %v2047_v37  ;;  %v2348_v37 = vpack.c.bf16 %v1810_v31, %v1809_v30 }
 0xc9e   :  { %2455 = vtanh.f32 %v1578_v36 }
 0xca5   :  { %v2452_v38 = vpop.eup %2451 }
 0xca6   :  { %v1574_v42 = vadd.f32 1.0, %v2452_v38  ;;  %v1811_v38 = vld [vmem:[%s2986_s6 + $0x40] sm:$0xff] }
 0xca7   :  { %v2454_v41 = vpop.eup %2453 }
 0xca8   :  { %v1584_v45 = vadd.f32 1.0, %v2454_v41  ;;  %v2456_v46 = vpop.eup %2455  ;;  %v1812_v41 = vld [vmem:[%s2986_s6 + $0x48] sm:$0xff] }
 0xcaa   :  { %2457 = vrcp.f32 %v1584_v45  ;;  %v1813_v45 = vld [vmem:[%s2986_s6 + $0x50] sm:$0xff] }
 0xcab   :  { %2459 = vrcp.f32 %v1574_v42  ;;  %v2351_v42 = vpack.c.bf16 %v1812_v41, %v1811_v38 }
 0xcb4   :  { %v2458_v44 = vpop.eup %2457 }
 0xcb5   :  { %v2460_v47 = vpop.eup %2459  ;;  %v1587_v48 = vsel %vm792_vm2, %v2456_v46, %v2458_v44  ;;  %v1814_v46 = vld [vmem:[%s2986_s6 + $0x58] sm:$0xff] }
 0xcb6   :  { %v1588_v51 = vmul.f32 %v2460_v47, %v1587_v48  ;;  %v1589_v52 = vmul.f32 %v2460_v47, %v1479_v20  ;;  %v1804_v20 = vld [vmem:[%s2986_s6 + $0x8] sm:$0xff]  ;;  %v2354_v44 = vpack.c.bf16 %v1814_v46, %v1813_v45  ;;  %v1815_v47 = vld [vmem:[%s2986_s6 + $0x60] sm:$0xff] }
 0xcb7   :  { %v2339_v23 = vpack.c.bf16 %v1804_v20, %v1803_v50 }
 0xcb8   :  { %1591 = vrot.lane.b32.xlu0 %v1588_v51, %s2477_s3 }
 0xd2a   :  { %v1592_v53 = vpop.permute.xlu0 %1591 }
 0xd2b   :  { %v1594_v54 = vadd.f32 %v1592_v53, %v1589_v52  ;;  %v1817_v53 = vld [vmem:[%s2986_s6 + $0x70] sm:$0xff] }
 0xd2d   :  { %2461 = vtanh.f32 %v1594_v54 }
 0xd37   :  { %v2462_v55 = vpop.eup %2461 }
 0xd38   :  { %v1596_v4 = vmul.f32 %v2462_v55, %v1587_v48  ;;  %v1816_v48 = vld [vmem:[%s2986_s6 + $0x68] sm:$0xff] }
 0xd39   :  { %v2357_v51 = vpack.c.bf16 %v1816_v48, %v1815_v47 }
 0xd3a   :  { %1599 = vrot.lane.b32.xlu1 %v1596_v4, %s2477_s3  ;;  %v1897_v4 = vld [vmem:[%s2987_s8] sm:$0xff] }
 0xdac   :  { %v1600_v6 = vpop.permute.xlu1 %1599 }
 0xdad   :  { %2048 = vmatmul.mubr.msk.f32.vlgmr.msra.gmra.mrb[14].mxu1 %vm794_vm3, %v1600_v6  ;;  %v1898_v6 = vld [vmem:[%s2987_s8 + $0x8] sm:$0xff] }
 0xdae   :  { %2144 = vmatprep.mubr.msk.f32.mxu1 %vm2479_vm4, %v2475_v3  ;;  %2340 = vmatpush3.bf16.msra.mxu1 %v2339_v23 }
 0xdaf   :  { %2341 = vmatprep.subr.bf16.mxu1 %v2478_v27 }
 0xdb2   :  { %2343 = vmatpush3.bf16.msra.mxu1 %v2342_v25 }
 0xdb3   :  { %2344 = vmatprep.subr.bf16.mxu1 %v2478_v27 }
 0xdb6   :  { %2346 = vmatpush3.bf16.msra.mxu1 %v2345_v29 }
 0xdb7   :  { %2347 = vmatprep.subr.bf16.mxu1 %v2478_v27 }
 0xdba   :  { %2349 = vmatpush3.bf16.msra.mxu1 %v2348_v37 }
 0xdbb   :  { %2350 = vmatprep.subr.bf16.mxu1 %v2478_v27 }
 0xdbe   :  { %2352 = vmatpush3.bf16.msra.mxu1 %v2351_v42 }
 0xdbf   :  { %2353 = vmatprep.subr.bf16.mxu1 %v2478_v27 }
 0xdc2   :  { %2355 = vmatpush3.bf16.msra.mxu1 %v2354_v44 }
 0xdc3   :  { %2356 = vmatprep.subr.bf16.mxu1 %v2478_v27 }
 0xdc6   :  { %2358 = vmatpush3.bf16.msra.mxu1 %v2357_v51 }
 0xdc7   :  { %2359 = vmatprep.subr.bf16.mxu1 %v2478_v27 }
 0xe80   :  { %v1669_v7 = vpop.f32.mrb[14].mxu1 }
 0xe81   :  { %v1671_v8 = vpop.f32.mrb[15].mxu1 }
 0xe82   :  { %v1676_v56 = vcombine.low %v1669_v7, %v1671_v8  ;;  %v2363_v7 = vpack.c.bf16 %v1898_v6, %v1897_v4  ;;  %v1900_v8 = vld [vmem:[%s2987_s8 + $0x18] sm:$0xff] }
 0xe84   :  { %v1683_v57 = vrot.slane %v1676_v56, %v2702_v16 }
 0xe86   :  { %v1685_v59 = vadd.f32 %v1683_v57, %v1597_v58  ;;  %v1901_v57 = vld [vmem:[%s2987_s8 + $0x20] sm:$0xff]  ;;  %v1902_v58 = vld [vmem:[%s2987_s8 + $0x28] sm:$0xff] }
 0xe88   :  { %v2049_v60 = vmul.f32 -1.442695, %v1685_v59  ;;  %v1693_v61 = vrot.slane %v1685_v59, 2  ;;  %v2369_v59 = vpack.c.bf16 %v1902_v58, %v1901_v57 }
 0xe8a   :  { %2463 = vpow2.f32 %v2049_v60  ;;  %v2050_v62 = vmul.f32 -1.442695, %v1693_v61  ;;  %v2051_v60 = vld [vmem:[%s2988_s5] ss:$0 sm:$0xff] }
 0xe8c   :  { %2465 = vpow2.f32 %v2050_v62 }
 0xe8d   :  { %2467 = vtanh.f32 %v1693_v61 }
 0xe94   :  { %v2464_v63 = vpop.eup %2463 }
 0xe95   :  { %v1689_v1 = vadd.f32 1.0, %v2464_v63 }
 0xe96   :  { %v2466_v0 = vpop.eup %2465 }
 0xe97   :  { %v1699_v2 = vadd.f32 1.0, %v2466_v0  ;;  %v2468_v5 = vpop.eup %2467 }
 0xe99   :  { %2469 = vrcp.f32 %v1699_v2  ;;  %v1904_v2 = vld [vmem:[%s2987_s8 + $0x38] sm:$0xff] }
 0xe9a   :  { %2471 = vrcp.f32 %v1689_v1  ;;  %v1903_v1 = vld [vmem:[%s2987_s8 + $0x30] sm:$0xff] }
 0xea3   :  { %v2470_v9 = vpop.eup %2469 }
 0xea4   :  { %v2472_v10 = vpop.eup %2471  ;;  %v1702_v16 = vsel %vm792_vm2, %v2468_v5, %v2470_v9  ;;  %v2372_v5 = vpack.c.bf16 %v1904_v2, %v1903_v1  ;;  %v2053_v9 = vld [vmem:[%s2989_s7] ss:$0 sm:$0xff] }
 0xea5   :  { %v1703_v11 = vmul.f32 %v2472_v10, %v1702_v16  ;;  %v1704_v18 = vmul.f32 %v2472_v10, %v1594_v54  ;;  %v1818_v54 = vld [vmem:[%s2986_s6 + $0x78] sm:$0xff] }
 0xea6   :  { %v2360_v55 = vpack.c.bf16 %v1818_v54, %v1817_v53 }
 0xea7   :  { %1706 = vrot.lane.b32.xlu0 %v1703_v11, %s2477_s3 }
 0xea8   :  { %2361 = vmatpush3.bf16.msra.mxu1 %v2360_v55 }
 0xf19   :  { %v1707_v19 = vpop.permute.xlu0 %1706 }
 0xf1a   :  { %v1709_v49 = vadd.f32 %v1707_v19, %v1704_v18 }
 0xf1c   :  { %2473 = vtanh.f32 %v1709_v49 }
 0xf26   :  { %v2474_v35 = vpop.eup %2473 }
 0xf27   :  { %v1711_v36 = vmul.f32 %v2474_v35, %v1702_v16 }
 0xf29   :  { %1728 = vrot.lane.b32.xlu1 %v1711_v36, %s2477_s3 }
 0xf9b   :  { %v1729_v52 = vpop.permute.xlu1 %1728 }
 0xf9c   :  { %2110 = vmatmul.mubr.msk.f32.vlgmr.msra.gmra.mrb[16].mxu0 %vm794_vm3, %v1729_v52 }
 0xf9d   :  { %2163 = vmatprep.mubr.msk.f32.mxu0 %vm2479_vm4, %v2475_v3  ;;  %v1899_v3 = vld [vmem:[%s2987_s8 + $0x10] sm:$0xff]  ;;  %2364 = vmatpush3.bf16.msra.mxu0 %v2363_v7 }
 0xf9e   :  { %v2366_v56 = vpack.c.bf16 %v1900_v8, %v1899_v3  ;;  %2365 = vmatprep.subr.bf16.mxu0 %v2478_v27 }
 0xfa1   :  { %2367 = vmatpush3.bf16.msra.mxu0 %v2366_v56 }
 0xfa2   :  { %2368 = vmatprep.subr.bf16.mxu0 %v2478_v27 }
 0xfa5   :  { %2370 = vmatpush3.bf16.msra.mxu0 %v2369_v59 }
 0xfa6   :  { %2371 = vmatprep.subr.bf16.mxu0 %v2478_v27 }
 0xfa9   :  { %2373 = vmatpush3.bf16.msra.mxu0 %v2372_v5 }
0x106f   :  { %v1798_v61 = vpop.f32.mrb[16].mxu0 }
0x1070   :  { %v1799_v62 = vadd.f32 %v2051_v60, %v1798_v61  ;;  %v2111_v63 = vpop.f32.mrb[17].mxu0 }
0x1072   :  { %v1802_v0 = vmax.f32 %v1799_v62, 0.0 }
0x1074   :  { %2145 = vmatmul.mubr.f32.vlgmr.msra.gmra.mrb[16].mxu1 %v1802_v0 }
0x1147   :  { %v1892_v10 = vpop.f32.mrb[16].mxu1 }
0x1148   :  { %v1893_v16 = vadd.f32 %v2053_v9, %v1892_v10  ;;  %v2146_v11 = vpop.f32.mrb[17].mxu1 }
0x114a   :  { %v1896_v27 = vmax.f32 %v1893_v16, 0.0 }
0x114c   :  { %2164 = vmatmul.mubr.msk.f32.vlgmr.msra.gmra.mrb[18].mxu0 %vm794_vm3, %v1896_v27 }
0x121f   :  { %v1981_v14 = vpop.f32.mrb[18].mxu0 }
0x1220   :  { %v1982_v32 = vadd.f32 %v2054_v13, %v1981_v14  ;;  %v2165_v28 = vpop.f32.mrb[19].mxu0 }
0x1222   :  { %v1985_v34 = vmax.f32 %v1982_v32, 0.0 }
0x1224   :  { %v1993_v15 = vmul.f32 %v2056_v33, %v1985_v34 }
0x1226   :  { %v1995_v39 = vsel %vm1994_vm5, %v1993_v15, 0.0 }
0x1227   :  { %1996 = vadd.xlane.f32.xlu0 %v1995_v39 }
0x12b4   :  { %v1997_v43 = vpop.xlane.xlu0 %1996 }
0x12b5   :  { %v2005_v17 = vadd.f32 %v2057_v40, %v1997_v43 }
0x12b7   :  { %2007 = vst.msk [vmem:[%s2993_s12] sm:$0x3] %vm2006_vm6, %v2005_v17 }

</bundles_post_ra>
